<compile_context>
chip_gen: v7x
topology: tpu7x:2x2x1
jax: 0.10.0
libtpu: 0.0.40
codegen_flags: <defaults>
</compile_context>

<pallas_src>
import functools

import jax
import jax.numpy as jnp
import numpy as np
from jax import lax
from jax.experimental import pallas as pl
from jax.experimental.pallas import tpu as pltpu


def _round_up(n, m):
    return ((n + m - 1) // m) * m


def _ode_kernel(t_ref, x0_ref, w1_ref, b1_ref, w2_ref, b2_ref, out_ref, x_scr,
                *, n_sub, t_blk):
    """Integrates one (batch-block, time-chunk) tile of the ODE.

    Grid is (n_batch_blocks, n_time_chunks) with the time axis fastest.  The
    integration state is carried across time chunks in the VMEM scratch
    `x_scr` (scratch persists across grid iterations) and re-initialized from
    x0 whenever a new batch block starts (time-chunk index == 0).  t_ref lives
    in SMEM (scalar prefetch) and is indexed with the *global* time index.
    """
    i = pl.program_id(1)  # time-chunk index (fastest grid axis)

    def f(x):
        # Weights/biases are read straight from VMEM refs on every call: vld
        # slots are idle in this latency-bound kernel, and this keeps vreg
        # pressure flat inside the unrolled RK4 body instead of pinning the
        # full weight tiles across the rolled time loop.
        h = jnp.tanh(
            jnp.dot(x, w1_ref[...], preferred_element_type=jnp.float32)
            + b1_ref[...])
        return (jnp.dot(h, w2_ref[...], preferred_element_type=jnp.float32)
                + b2_ref[...])

    @pl.when(i == 0)
    def _():
        x0 = x0_ref[...]
        x_scr[...] = x0
        out_ref[0] = x0.astype(out_ref.dtype)

    def time_step(j, x):
        g = i * t_blk + j                       # global time index
        dt = (t_ref[g] - t_ref[g - 1]) / jnp.float32(n_sub)

        def rk4_step(_, xc):
            k1 = f(xc)
            k2 = f(xc + (0.5 * dt) * k1)
            k3 = f(xc + (0.5 * dt) * k2)
            k4 = f(xc + dt * k3)
            return xc + (dt / 6.0) * (k1 + 2.0 * k2 + 2.0 * k3 + k4)

        # Short fixed trip count -> unroll for scheduler visibility.
        x = lax.fori_loop(0, n_sub, rk4_step, x, unroll=True)
        out_ref[j] = x.astype(out_ref.dtype)
        return x

    # The very first chunk skips its local j=0 point (it is x0, written above).
    start = jnp.where(i == 0, 1, 0)
    # Outer time loop stays rolled: bounds live ranges, keeps vreg pressure flat.
    x_scr[...] = lax.fori_loop(start, t_blk, time_step, x_scr[...])


def neural_ode(x0, t, w1, b1, w2, b2, *, n_sub=4, t_blk=4):
    """Pallas NeuralODE forward: returns (T, B, D) solution at the times in t."""
    T = t.shape[0]
    B, D = x0.shape
    H = w1.shape[1]
    out_dtype = x0.dtype

    # ---- lane/sublane-dense padding --------------------------------------
    Dp = _round_up(D, 128)
    Hp = _round_up(H, 128)
    # Batch block size: also the MXU row count per matmul.  For MXU-filling
    # throughput, callers should batch toward 128 (v5e) / 256 (v6e/v7x) rows;
    # the serial RK4 chain length is unchanged so extra batch is nearly free.
    Bp = _round_up(B, 8)
    b_blk = Bp if Bp <= 256 else 256
    Bp = _round_up(Bp, b_blk)
    n_b = Bp // b_blk

    # Time chunking: pad t by repeating the final value (dt == 0 -> RK4 is the
    # identity, so padded steps are exact) so the chunk size divides T.
    t_blk = max(1, min(t_blk, T))
    Tp = _round_up(T, t_blk)
    n_t = Tp // t_blk

    f32 = jnp.float32
    x0_p = jnp.pad(x0.astype(f32), ((0, Bp - B), (0, Dp - D)))
    w1_p = jnp.pad(w1.astype(f32), ((0, Dp - D), (0, Hp - H)))
    b1_p = jnp.pad(b1.astype(f32).reshape(1, H), ((0, 0), (0, Hp - H)))
    w2_p = jnp.pad(w2.astype(f32), ((0, Hp - H), (0, Dp - D)))
    b2_p = jnp.pad(b2.astype(f32).reshape(1, D), ((0, 0), (0, Dp - D)))
    t_p = jnp.pad(t.astype(f32), (0, Tp - T), mode="edge")

    grid_spec = pltpu.PrefetchScalarGridSpec(
        num_scalar_prefetch=1,        # t lives in SMEM, read with dynamic index
        grid=(n_b, n_t),              # batch blocks (parallel) x time chunks
        in_specs=[
            pl.BlockSpec((b_blk, Dp), lambda b, i, t_sm: (b, 0)),   # x0
            pl.BlockSpec((Dp, Hp), lambda b, i, t_sm: (0, 0)),      # W1 (resident)
            pl.BlockSpec((1, Hp), lambda b, i, t_sm: (0, 0)),       # b1
            pl.BlockSpec((Hp, Dp), lambda b, i, t_sm: (0, 0)),      # W2 (resident)
            pl.BlockSpec((1, Dp), lambda b, i, t_sm: (0, 0)),       # b2
        ],
        out_specs=pl.BlockSpec((t_blk, b_blk, Dp),
                               lambda b, i, t_sm: (i, b, 0)),
        scratch_shapes=[pltpu.VMEM((b_blk, Dp), jnp.float32)],  # carried state
    )

    # ---- generation-aware VMEM budget -------------------------------------
    out_isz = jnp.dtype(out_dtype).itemsize
    buf_bytes = (
        2 * b_blk * Dp * 4                 # x0 block (double-buffered)
        + 2 * Dp * Hp * 4                  # W1
        + 2 * 8 * Hp * 4                   # b1 (sublane-padded)
        + 2 * Hp * Dp * 4                  # W2
        + 2 * 8 * Dp * 4                   # b2
        + 2 * t_blk * b_blk * Dp * out_isz  # output chunk (double-buffered)
        + b_blk * Dp * 4                   # carried-state scratch
    )
    needed = buf_bytes + (8 << 20)         # headroom for compiler temporaries
    try:
        vmem_cap = getattr(pltpu.get_tpu_info(), "vmem_capacity_bytes", 64 << 20)
    except Exception:                       # pragma: no cover - info query fallback
        vmem_cap = 64 << 20
    vmem_limit = int(min(max(needed, 32 << 20), int(0.75 * vmem_cap)))

    cost = pl.CostEstimate(
        flops=int((T - 1) * n_sub * 4 * 4 * Bp * Dp * Hp),
        transcendentals=int((T - 1) * n_sub * 4 * Bp * Hp),
        bytes_accessed=int(4 * (Bp * Dp + 2 * Dp * Hp + Hp + Dp + Tp)
                           + Tp * Bp * Dp * out_isz),
    )

    out = pl.pallas_call(
        functools.partial(_ode_kernel, n_sub=n_sub, t_blk=t_blk),
        out_shape=jax.ShapeDtypeStruct((Tp, Bp, Dp), out_dtype),
        grid_spec=grid_spec,
        compiler_params=pltpu.CompilerParams(
            dimension_semantics=("parallel", "arbitrary"),
            vmem_limit_bytes=vmem_limit,
        ),
        cost_estimate=cost,
    )(t_p, x0_p, w1_p, b1_p, w2_p, b2_p)

    return out[:T, :B, :D]


def neural_ode_ref(x0, t, w1, b1, w2, b2, *, n_sub=4):
    """Pure-JAX reference (same RK4 discretization) for validation."""
    def f(x):
        return jnp.tanh(x @ w1 + b1) @ w2 + b2

    def interval(x, t_pair):
        t0, t1 = t_pair
        dt = (t1 - t0) / n_sub

        def rk4_step(_, x):
            k1 = f(x)
            k2 = f(x + 0.5 * dt * k1)
            k3 = f(x + 0.5 * dt * k2)
            k4 = f(x + dt * k3)
            return x + (dt / 6.0) * (k1 + 2.0 * k2 + 2.0 * k3 + k4)

        x = lax.fori_loop(0, n_sub, rk4_step, x)
        return x, x

    _, xs = lax.scan(interval, x0, (t[:-1], t[1:]))
    return jnp.concatenate([x0[None], xs], axis=0)


if __name__ == "__main__":
    B, D, H, T = 8, 32, 32, 8

    key = jax.random.PRNGKey(0)
    k_x0, k_w1, k_b1, k_w2, k_b2 = jax.random.split(key, 5)

    x0 = jax.random.normal(k_x0, (B, D), dtype=jnp.float32)
    t = jnp.linspace(0.0, 1.0, T, dtype=jnp.float32)

    # Deterministic MLP ODE-func parameters (synthetic init, not a checkpoint).
    w1 = 0.1 * jax.random.normal(k_w1, (D, H), dtype=jnp.float32)
    b1 = 0.1 * jax.random.normal(k_b1, (H,), dtype=jnp.float32)
    w2 = 0.1 * jax.random.normal(k_w2, (H, D), dtype=jnp.float32)
    b2 = 0.1 * jax.random.normal(k_b2, (D,), dtype=jnp.float32)

    out = neural_ode(x0, t, w1, b1, w2, b2)
    out = jax.block_until_ready(out)

    ref = jax.block_until_ready(neural_ode_ref(x0, t, w1, b1, w2, b2))
    np.testing.assert_allclose(np.asarray(out), np.asarray(ref),
                               rtol=1e-5, atol=1e-5)

    print("KERNEL_OK")
</pallas_src>

<mosaic_0001>
module attributes {stable_mosaic.version = 11 : i64} {
  func.func @_ode_kernel(%arg0: i32, %arg1: i32, %arg2: memref<8xf32, #tpu.memory_space<smem>>, %arg3: memref<8x128xf32, #tpu.memory_space<vmem>>, %arg4: memref<128x128xf32, #tpu.memory_space<vmem>>, %arg5: memref<1x128xf32, #tpu.memory_space<vmem>>, %arg6: memref<128x128xf32, #tpu.memory_space<vmem>>, %arg7: memref<1x128xf32, #tpu.memory_space<vmem>>, %arg8: memref<4x8x128xf32, #tpu.memory_space<vmem>>, %arg9: memref<8x128xf32, #tpu.memory_space<vmem>>) attributes {dimension_semantics = [#tpu.dimension_semantics<parallel>, #tpu.dimension_semantics<arbitrary>], iteration_bounds = array<i64: 1, 2>, scalar_prefetch = 1 : i64, scratch_operands = 1 : i64, tpu.core_type = #tpu.core_type<tc>, window_params = [{transform_indices = @transform_0, window_bounds = array<i64: 8, 128>}, {pipeline_mode = #tpu.pipeline_mode<synchronous>, transform_indices = @transform_1, window_bounds = array<i64: 128, 128>}, {pipeline_mode = #tpu.pipeline_mode<synchronous>, transform_indices = @transform_2, window_bounds = array<i64: 1, 128>}, {pipeline_mode = #tpu.pipeline_mode<synchronous>, transform_indices = @transform_3, window_bounds = array<i64: 128, 128>}, {pipeline_mode = #tpu.pipeline_mode<synchronous>, transform_indices = @transform_4, window_bounds = array<i64: 1, 128>}, {transform_indices = @transform_5, window_bounds = array<i64: 4, 8, 128>}]} {
    %c0_i32 = arith.constant 0 : i32
    %0 = arith.cmpi eq, %arg1, %c0_i32 : i32
    %1 = arith.extui %0 : i1 to i32
    %c0_i32_0 = arith.constant 0 : i32
    %2 = arith.cmpi ne, %1, %c0_i32_0 : i32
    scf.if %2 {
      %c0_7 = arith.constant 0 : index
      %c0_8 = arith.constant 0 : index
      %10 = vector.load %arg3[%c0_7, %c0_8] : memref<8x128xf32, #tpu.memory_space<vmem>>, vector<8x128xf32>
      %c0_9 = arith.constant 0 : index
      %c0_10 = arith.constant 0 : index
      %11 = vector.load %arg9[%c0_9, %c0_10] : memref<8x128xf32, #tpu.memory_space<vmem>>, vector<8x128xf32>
      tpu.vector_store %arg9[%c0_9, %c0_10], %10 {strides = array<i32>} : memref<8x128xf32, #tpu.memory_space<vmem>>, vector<8x128xf32>,
      %c0_11 = arith.constant 0 : index
      %c0_12 = arith.constant 0 : index
      %c0_13 = arith.constant 0 : index
      %12 = vector.load %arg8[%c0_11, %c0_12, %c0_13] : memref<4x8x128xf32, #tpu.memory_space<vmem>>, vector<1x8x128xf32>
      %13 = vector.shape_cast %12 : vector<1x8x128xf32> to vector<8x128xf32>
      %14 = vector.shape_cast %10 : vector<8x128xf32> to vector<1x8x128xf32>
      tpu.vector_store %arg8[%c0_11, %c0_12, %c0_13], %14 {strides = array<i32>} : memref<4x8x128xf32, #tpu.memory_space<vmem>>, vector<1x8x128xf32>,
    } else {
    }
    %c0_i32_1 = arith.constant 0 : i32
    %3 = arith.cmpi eq, %arg1, %c0_i32_1 : i32
    %c1_i32 = arith.constant 1 : i32
    %c0_i32_2 = arith.constant 0 : i32
    %4 = arith.select %3, %c1_i32, %c0_i32_2 : i32
    %c0 = arith.constant 0 : index
    %c0_3 = arith.constant 0 : index
    %5 = vector.load %arg9[%c0, %c0_3] : memref<8x128xf32, #tpu.memory_space<vmem>>, vector<8x128xf32>
    %c4_i32 = arith.constant 4 : i32
    %6 = arith.subi %c4_i32, %4 : i32
    %7 = arith.addi %4, %6 : i32
    %c1_i32_4 = arith.constant 1 : i32
    %8 = scf.for %arg10 = %4 to %7 step %c1_i32_4 iter_args(%arg11 = %5) -> (vector<8x128xf32>)  : i32 {
      %c4_i32_7 = arith.constant 4 : i32
      %10 = arith.muli %arg1, %c4_i32_7 : i32
      %11 = arith.addi %10, %arg10 : i32
      %12 = arith.index_cast %11 : i32 to index
      %13 = memref.load %arg2[%12] : memref<8xf32, #tpu.memory_space<smem>>
      %c1_i32_8 = arith.constant 1 : i32
      %14 = arith.subi %11, %c1_i32_8 : i32
      %15 = arith.index_cast %14 : i32 to index
      %16 = memref.load %arg2[%15] : memref<8xf32, #tpu.memory_space<smem>>
      %17 = arith.subf %13, %16 : f32
      %cst = arith.constant 4.000000e+00 : f32
      %18 = arith.divf %17, %cst : f32
      %c0_i32_9 = arith.constant 0 : i32
      %c0_10 = arith.constant 0 : index
      %c0_11 = arith.constant 0 : index
      %19 = vector.load %arg4[%c0_10, %c0_11] : memref<128x128xf32, #tpu.memory_space<vmem>>, vector<128x128xf32>
      %cst_12 = arith.constant dense<0.000000e+00> : vector<8x128xf32>
      %20 = tpu.matmul %arg11, %19, %cst_12 {dimension_numbers = #tpu.dot_dimension_numbers<[1], [0], [0], [1], [0, 0, 1, 1], [], []>} : vector<8x128xf32>, vector<128x128xf32>, vector<8x128xf32> -> vector<8x128xf32>
      %c0_13 = arith.constant 0 : index
      %c0_14 = arith.constant 0 : index
      %21 = vector.load %arg5[%c0_13, %c0_14] : memref<1x128xf32, #tpu.memory_space<vmem>>, vector<1x128xf32>
      %22 = vector.broadcast %21 : vector<1x128xf32> to vector<8x128xf32>
      %23 = arith.addf %20, %22 : vector<8x128xf32>
      %24 = math.tanh %23 : vector<8x128xf32>
      %c0_15 = arith.constant 0 : index
      %c0_16 = arith.constant 0 : index
      %25 = vector.load %arg6[%c0_15, %c0_16] : memref<128x128xf32, #tpu.memory_space<vmem>>, vector<128x128xf32>
      %cst_17 = arith.constant dense<0.000000e+00> : vector<8x128xf32>
      %26 = tpu.matmul %24, %25, %cst_17 {dimension_numbers = #tpu.dot_dimension_numbers<[1], [0], [0], [1], [0, 0, 1, 1], [], []>} : vector<8x128xf32>, vector<128x128xf32>, vector<8x128xf32> -> vector<8x128xf32>
      %c0_18 = arith.constant 0 : index
      %c0_19 = arith.constant 0 : index
      %27 = vector.load %arg7[%c0_18, %c0_19] : memref<1x128xf32, #tpu.memory_space<vmem>>, vector<1x128xf32>
      %28 = vector.broadcast %27 : vector<1x128xf32> to vector<8x128xf32>
      %29 = arith.addf %26, %28 : vector<8x128xf32>
      %cst_20 = arith.constant 5.000000e-01 : f32
      %30 = arith.mulf %cst_20, %18 : f32
      %31 = vector.broadcast %30 : f32 to vector<8x128xf32>
      %32 = arith.mulf %31, %29 : vector<8x128xf32>
      %33 = arith.addf %arg11, %32 : vector<8x128xf32>
      %c0_21 = arith.constant 0 : index
      %c0_22 = arith.constant 0 : index
      %34 = vector.load %arg4[%c0_21, %c0_22] : memref<128x128xf32, #tpu.memory_space<vmem>>, vector<128x128xf32>
      %cst_23 = arith.constant dense<0.000000e+00> : vector<8x128xf32>
      %35 = tpu.matmul %33, %34, %cst_23 {dimension_numbers = #tpu.dot_dimension_numbers<[1], [0], [0], [1], [0, 0, 1, 1], [], []>} : vector<8x128xf32>, vector<128x128xf32>, vector<8x128xf32> -> vector<8x128xf32>
      %c0_24 = arith.constant 0 : index
      %c0_25 = arith.constant 0 : index
      %36 = vector.load %arg5[%c0_24, %c0_25] : memref<1x128xf32, #tpu.memory_space<vmem>>, vector<1x128xf32>
      %37 = vector.broadcast %36 : vector<1x128xf32> to vector<8x128xf32>
      %38 = arith.addf %35, %37 : vector<8x128xf32>
      %39 = math.tanh %38 : vector<8x128xf32>
      %c0_26 = arith.constant 0 : index
      %c0_27 = arith.constant 0 : index
      %40 = vector.load %arg6[%c0_26, %c0_27] : memref<128x128xf32, #tpu.memory_space<vmem>>, vector<128x128xf32>
      %cst_28 = arith.constant dense<0.000000e+00> : vector<8x128xf32>
      %41 = tpu.matmul %39, %40, %cst_28 {dimension_numbers = #tpu.dot_dimension_numbers<[1], [0], [0], [1], [0, 0, 1, 1], [], []>} : vector<8x128xf32>, vector<128x128xf32>, vector<8x128xf32> -> vector<8x128xf32>
      %c0_29 = arith.constant 0 : index
      %c0_30 = arith.constant 0 : index
      %42 = vector.load %arg7[%c0_29, %c0_30] : memref<1x128xf32, #tpu.memory_space<vmem>>, vector<1x128xf32>
      %43 = vector.broadcast %42 : vector<1x128xf32> to vector<8x128xf32>
      %44 = arith.addf %41, %43 : vector<8x128xf32>
      %cst_31 = arith.constant 5.000000e-01 : f32
      %45 = arith.mulf %cst_31, %18 : f32
      %46 = vector.broadcast %45 : f32 to vector<8x128xf32>
      %47 = arith.mulf %46, %44 : vector<8x128xf32>
      %48 = arith.addf %arg11, %47 : vector<8x128xf32>
      %c0_32 = arith.constant 0 : index
      %c0_33 = arith.constant 0 : index
      %49 = vector.load %arg4[%c0_32, %c0_33] : memref<128x128xf32, #tpu.memory_space<vmem>>, vector<128x128xf32>
      %cst_34 = arith.constant dense<0.000000e+00> : vector<8x128xf32>
      %50 = tpu.matmul %48, %49, %cst_34 {dimension_numbers = #tpu.dot_dimension_numbers<[1], [0], [0], [1], [0, 0, 1, 1], [], []>} : vector<8x128xf32>, vector<128x128xf32>, vector<8x128xf32> -> vector<8x128xf32>
      %c0_35 = arith.constant 0 : index
      %c0_36 = arith.constant 0 : index
      %51 = vector.load %arg5[%c0_35, %c0_36] : memref<1x128xf32, #tpu.memory_space<vmem>>, vector<1x128xf32>
      %52 = vector.broadcast %51 : vector<1x128xf32> to vector<8x128xf32>
      %53 = arith.addf %50, %52 : vector<8x128xf32>
      %54 = math.tanh %53 : vector<8x128xf32>
      %c0_37 = arith.constant 0 : index
      %c0_38 = arith.constant 0 : index
      %55 = vector.load %arg6[%c0_37, %c0_38] : memref<128x128xf32, #tpu.memory_space<vmem>>, vector<128x128xf32>
      %cst_39 = arith.constant dense<0.000000e+00> : vector<8x128xf32>
      %56 = tpu.matmul %54, %55, %cst_39 {dimension_numbers = #tpu.dot_dimension_numbers<[1], [0], [0], [1], [0, 0, 1, 1], [], []>} : vector<8x128xf32>, vector<128x128xf32>, vector<8x128xf32> -> vector<8x128xf32>
      %c0_40 = arith.constant 0 : index
      %c0_41 = arith.constant 0 : index
      %57 = vector.load %arg7[%c0_40, %c0_41] : memref<1x128xf32, #tpu.memory_space<vmem>>, vector<1x128xf32>
      %58 = vector.broadcast %57 : vector<1x128xf32> to vector<8x128xf32>
      %59 = arith.addf %56, %58 : vector<8x128xf32>
      %60 = vector.broadcast %18 : f32 to vector<8x128xf32>
      %61 = arith.mulf %60, %59 : vector<8x128xf32>
      %62 = arith.addf %arg11, %61 : vector<8x128xf32>
      %c0_42 = arith.constant 0 : index
      %c0_43 = arith.constant 0 : index
      %63 = vector.load %arg4[%c0_42, %c0_43] : memref<128x128xf32, #tpu.memory_space<vmem>>, vector<128x128xf32>
      %cst_44 = arith.constant dense<0.000000e+00> : vector<8x128xf32>
      %64 = tpu.matmul %62, %63, %cst_44 {dimension_numbers = #tpu.dot_dimension_numbers<[1], [0], [0], [1], [0, 0, 1, 1], [], []>} : vector<8x128xf32>, vector<128x128xf32>, vector<8x128xf32> -> vector<8x128xf32>
      %c0_45 = arith.constant 0 : index
      %c0_46 = arith.constant 0 : index
      %65 = vector.load %arg5[%c0_45, %c0_46] : memref<1x128xf32, #tpu.memory_space<vmem>>, vector<1x128xf32>
      %66 = vector.broadcast %65 : vector<1x128xf32> to vector<8x128xf32>
      %67 = arith.addf %64, %66 : vector<8x128xf32>
      %68 = math.tanh %67 : vector<8x128xf32>
      %c0_47 = arith.constant 0 : index
      %c0_48 = arith.constant 0 : index
      %69 = vector.load %arg6[%c0_47, %c0_48] : memref<128x128xf32, #tpu.memory_space<vmem>>, vector<128x128xf32>
      %cst_49 = arith.constant dense<0.000000e+00> : vector<8x128xf32>
      %70 = tpu.matmul %68, %69, %cst_49 {dimension_numbers = #tpu.dot_dimension_numbers<[1], [0], [0], [1], [0, 0, 1, 1], [], []>} : vector<8x128xf32>, vector<128x128xf32>, vector<8x128xf32> -> vector<8x128xf32>
      %c0_50 = arith.constant 0 : index
      %c0_51 = arith.constant 0 : index
      %71 = vector.load %arg7[%c0_50, %c0_51] : memref<1x128xf32, #tpu.memory_space<vmem>>, vector<1x128xf32>
      %72 = vector.broadcast %71 : vector<1x128xf32> to vector<8x128xf32>
      %73 = arith.addf %70, %72 : vector<8x128xf32>
      %cst_52 = arith.constant 6.000000e+00 : f32
      %74 = arith.divf %18, %cst_52 : f32
      %cst_53 = arith.constant 2.000000e+00 : f32
      %75 = vector.broadcast %cst_53 : f32 to vector<8x128xf32>
      %76 = arith.mulf %75, %44 : vector<8x128xf32>
      %77 = arith.addf %29, %76 : vector<8x128xf32>
      %cst_54 = arith.constant 2.000000e+00 : f32
      %78 = vector.broadcast %cst_54 : f32 to vector<8x128xf32>
      %79 = arith.mulf %78, %59 : vector<8x128xf32>
      %80 = arith.addf %77, %79 : vector<8x128xf32>
      %81 = arith.addf %80, %73 : vector<8x128xf32>
      %82 = vector.broadcast %74 : f32 to vector<8x128xf32>
      %83 = arith.mulf %82, %81 : vector<8x128xf32>
      %84 = arith.addf %arg11, %83 : vector<8x128xf32>
      %c1_i32_55 = arith.constant 1 : i32
      %c0_56 = arith.constant 0 : index
      %c0_57 = arith.constant 0 : index
      %85 = vector.load %arg4[%c0_56, %c0_57] : memref<128x128xf32, #tpu.memory_space<vmem>>, vector<128x128xf32>
      %cst_58 = arith.constant dense<0.000000e+00> : vector<8x128xf32>
      %86 = tpu.matmul %84, %85, %cst_58 {dimension_numbers = #tpu.dot_dimension_numbers<[1], [0], [0], [1], [0, 0, 1, 1], [], []>} : vector<8x128xf32>, vector<128x128xf32>, vector<8x128xf32> -> vector<8x128xf32>
      %c0_59 = arith.constant 0 : index
      %c0_60 = arith.constant 0 : index
      %87 = vector.load %arg5[%c0_59, %c0_60] : memref<1x128xf32, #tpu.memory_space<vmem>>, vector<1x128xf32>
      %88 = vector.broadcast %87 : vector<1x128xf32> to vector<8x128xf32>
      %89 = arith.addf %86, %88 : vector<8x128xf32>
      %90 = math.tanh %89 : vector<8x128xf32>
      %c0_61 = arith.constant 0 : index
      %c0_62 = arith.constant 0 : index
      %91 = vector.load %arg6[%c0_61, %c0_62] : memref<128x128xf32, #tpu.memory_space<vmem>>, vector<128x128xf32>
      %cst_63 = arith.constant dense<0.000000e+00> : vector<8x128xf32>
      %92 = tpu.matmul %90, %91, %cst_63 {dimension_numbers = #tpu.dot_dimension_numbers<[1], [0], [0], [1], [0, 0, 1, 1], [], []>} : vector<8x128xf32>, vector<128x128xf32>, vector<8x128xf32> -> vector<8x128xf32>
      %c0_64 = arith.constant 0 : index
      %c0_65 = arith.constant 0 : index
      %93 = vector.load %arg7[%c0_64, %c0_65] : memref<1x128xf32, #tpu.memory_space<vmem>>, vector<1x128xf32>
      %94 = vector.broadcast %93 : vector<1x128xf32> to vector<8x128xf32>
      %95 = arith.addf %92, %94 : vector<8x128xf32>
      %cst_66 = arith.constant 5.000000e-01 : f32
      %96 = arith.mulf %cst_66, %18 : f32
      %97 = vector.broadcast %96 : f32 to vector<8x128xf32>
      %98 = arith.mulf %97, %95 : vector<8x128xf32>
      %99 = arith.addf %84, %98 : vector<8x128xf32>
      %c0_67 = arith.constant 0 : index
      %c0_68 = arith.constant 0 : index
      %100 = vector.load %arg4[%c0_67, %c0_68] : memref<128x128xf32, #tpu.memory_space<vmem>>, vector<128x128xf32>
      %cst_69 = arith.constant dense<0.000000e+00> : vector<8x128xf32>
      %101 = tpu.matmul %99, %100, %cst_69 {dimension_numbers = #tpu.dot_dimension_numbers<[1], [0], [0], [1], [0, 0, 1, 1], [], []>} : vector<8x128xf32>, vector<128x128xf32>, vector<8x128xf32> -> vector<8x128xf32>
      %c0_70 = arith.constant 0 : index
      %c0_71 = arith.constant 0 : index
      %102 = vector.load %arg5[%c0_70, %c0_71] : memref<1x128xf32, #tpu.memory_space<vmem>>, vector<1x128xf32>
      %103 = vector.broadcast %102 : vector<1x128xf32> to vector<8x128xf32>
      %104 = arith.addf %101, %103 : vector<8x128xf32>
      %105 = math.tanh %104 : vector<8x128xf32>
      %c0_72 = arith.constant 0 : index
      %c0_73 = arith.constant 0 : index
      %106 = vector.load %arg6[%c0_72, %c0_73] : memref<128x128xf32, #tpu.memory_space<vmem>>, vector<128x128xf32>
      %cst_74 = arith.constant dense<0.000000e+00> : vector<8x128xf32>
      %107 = tpu.matmul %105, %106, %cst_74 {dimension_numbers = #tpu.dot_dimension_numbers<[1], [0], [0], [1], [0, 0, 1, 1], [], []>} : vector<8x128xf32>, vector<128x128xf32>, vector<8x128xf32> -> vector<8x128xf32>
      %c0_75 = arith.constant 0 : index
      %c0_76 = arith.constant 0 : index
      %108 = vector.load %arg7[%c0_75, %c0_76] : memref<1x128xf32, #tpu.memory_space<vmem>>, vector<1x128xf32>
      %109 = vector.broadcast %108 : vector<1x128xf32> to vector<8x128xf32>
      %110 = arith.addf %107, %109 : vector<8x128xf32>
      %cst_77 = arith.constant 5.000000e-01 : f32
      %111 = arith.mulf %cst_77, %18 : f32
      %112 = vector.broadcast %111 : f32 to vector<8x128xf32>
      %113 = arith.mulf %112, %110 : vector<8x128xf32>
      %114 = arith.addf %84, %113 : vector<8x128xf32>
      %c0_78 = arith.constant 0 : index
      %c0_79 = arith.constant 0 : index
      %115 = vector.load %arg4[%c0_78, %c0_79] : memref<128x128xf32, #tpu.memory_space<vmem>>, vector<128x128xf32>
      %cst_80 = arith.constant dense<0.000000e+00> : vector<8x128xf32>
      %116 = tpu.matmul %114, %115, %cst_80 {dimension_numbers = #tpu.dot_dimension_numbers<[1], [0], [0], [1], [0, 0, 1, 1], [], []>} : vector<8x128xf32>, vector<128x128xf32>, vector<8x128xf32> -> vector<8x128xf32>
      %c0_81 = arith.constant 0 : index
      %c0_82 = arith.constant 0 : index
      %117 = vector.load %arg5[%c0_81, %c0_82] : memref<1x128xf32, #tpu.memory_space<vmem>>, vector<1x128xf32>
      %118 = vector.broadcast %117 : vector<1x128xf32> to vector<8x128xf32>
      %119 = arith.addf %116, %118 : vector<8x128xf32>
      %120 = math.tanh %119 : vector<8x128xf32>
      %c0_83 = arith.constant 0 : index
      %c0_84 = arith.constant 0 : index
      %121 = vector.load %arg6[%c0_83, %c0_84] : memref<128x128xf32, #tpu.memory_space<vmem>>, vector<128x128xf32>
      %cst_85 = arith.constant dense<0.000000e+00> : vector<8x128xf32>
      %122 = tpu.matmul %120, %121, %cst_85 {dimension_numbers = #tpu.dot_dimension_numbers<[1], [0], [0], [1], [0, 0, 1, 1], [], []>} : vector<8x128xf32>, vector<128x128xf32>, vector<8x128xf32> -> vector<8x128xf32>
      %c0_86 = arith.constant 0 : index
      %c0_87 = arith.constant 0 : index
      %123 = vector.load %arg7[%c0_86, %c0_87] : memref<1x128xf32, #tpu.memory_space<vmem>>, vector<1x128xf32>
      %124 = vector.broadcast %123 : vector<1x128xf32> to vector<8x128xf32>
      %125 = arith.addf %122, %124 : vector<8x128xf32>
      %126 = vector.broadcast %18 : f32 to vector<8x128xf32>
      %127 = arith.mulf %126, %125 : vector<8x128xf32>
      %128 = arith.addf %84, %127 : vector<8x128xf32>
      %c0_88 = arith.constant 0 : index
      %c0_89 = arith.constant 0 : index
      %129 = vector.load %arg4[%c0_88, %c0_89] : memref<128x128xf32, #tpu.memory_space<vmem>>, vector<128x128xf32>
      %cst_90 = arith.constant dense<0.000000e+00> : vector<8x128xf32>
      %130 = tpu.matmul %128, %129, %cst_90 {dimension_numbers = #tpu.dot_dimension_numbers<[1], [0], [0], [1], [0, 0, 1, 1], [], []>} : vector<8x128xf32>, vector<128x128xf32>, vector<8x128xf32> -> vector<8x128xf32>
      %c0_91 = arith.constant 0 : index
      %c0_92 = arith.constant 0 : index
      %131 = vector.load %arg5[%c0_91, %c0_92] : memref<1x128xf32, #tpu.memory_space<vmem>>, vector<1x128xf32>
      %132 = vector.broadcast %131 : vector<1x128xf32> to vector<8x128xf32>
      %133 = arith.addf %130, %132 : vector<8x128xf32>
      %134 = math.tanh %133 : vector<8x128xf32>
      %c0_93 = arith.constant 0 : index
      %c0_94 = arith.constant 0 : index
      %135 = vector.load %arg6[%c0_93, %c0_94] : memref<128x128xf32, #tpu.memory_space<vmem>>, vector<128x128xf32>
      %cst_95 = arith.constant dense<0.000000e+00> : vector<8x128xf32>
      %136 = tpu.matmul %134, %135, %cst_95 {dimension_numbers = #tpu.dot_dimension_numbers<[1], [0], [0], [1], [0, 0, 1, 1], [], []>} : vector<8x128xf32>, vector<128x128xf32>, vector<8x128xf32> -> vector<8x128xf32>
      %c0_96 = arith.constant 0 : index
      %c0_97 = arith.constant 0 : index
      %137 = vector.load %arg7[%c0_96, %c0_97] : memref<1x128xf32, #tpu.memory_space<vmem>>, vector<1x128xf32>
      %138 = vector.broadcast %137 : vector<1x128xf32> to vector<8x128xf32>
      %139 = arith.addf %136, %138 : vector<8x128xf32>
      %cst_98 = arith.constant 6.000000e+00 : f32
      %140 = arith.divf %18, %cst_98 : f32
      %cst_99 = arith.constant 2.000000e+00 : f32
      %141 = vector.broadcast %cst_99 : f32 to vector<8x128xf32>
      %142 = arith.mulf %141, %110 : vector<8x128xf32>
      %143 = arith.addf %95, %142 : vector<8x128xf32>
      %cst_100 = arith.constant 2.000000e+00 : f32
      %144 = vector.broadcast %cst_100 : f32 to vector<8x128xf32>
      %145 = arith.mulf %144, %125 : vector<8x128xf32>
      %146 = arith.addf %143, %145 : vector<8x128xf32>
      %147 = arith.addf %146, %139 : vector<8x128xf32>
      %148 = vector.broadcast %140 : f32 to vector<8x128xf32>
      %149 = arith.mulf %148, %147 : vector<8x128xf32>
      %150 = arith.addf %84, %149 : vector<8x128xf32>
      %c2_i32 = arith.constant 2 : i32
      %c0_101 = arith.constant 0 : index
      %c0_102 = arith.constant 0 : index
      %151 = vector.load %arg4[%c0_101, %c0_102] : memref<128x128xf32, #tpu.memory_space<vmem>>, vector<128x128xf32>
      %cst_103 = arith.constant dense<0.000000e+00> : vector<8x128xf32>
      %152 = tpu.matmul %150, %151, %cst_103 {dimension_numbers = #tpu.dot_dimension_numbers<[1], [0], [0], [1], [0, 0, 1, 1], [], []>} : vector<8x128xf32>, vector<128x128xf32>, vector<8x128xf32> -> vector<8x128xf32>
      %c0_104 = arith.constant 0 : index
      %c0_105 = arith.constant 0 : index
      %153 = vector.load %arg5[%c0_104, %c0_105] : memref<1x128xf32, #tpu.memory_space<vmem>>, vector<1x128xf32>
      %154 = vector.broadcast %153 : vector<1x128xf32> to vector<8x128xf32>
      %155 = arith.addf %152, %154 : vector<8x128xf32>
      %156 = math.tanh %155 : vector<8x128xf32>
      %c0_106 = arith.constant 0 : index
      %c0_107 = arith.constant 0 : index
      %157 = vector.load %arg6[%c0_106, %c0_107] : memref<128x128xf32, #tpu.memory_space<vmem>>, vector<128x128xf32>
      %cst_108 = arith.constant dense<0.000000e+00> : vector<8x128xf32>
      %158 = tpu.matmul %156, %157, %cst_108 {dimension_numbers = #tpu.dot_dimension_numbers<[1], [0], [0], [1], [0, 0, 1, 1], [], []>} : vector<8x128xf32>, vector<128x128xf32>, vector<8x128xf32> -> vector<8x128xf32>
      %c0_109 = arith.constant 0 : index
      %c0_110 = arith.constant 0 : index
      %159 = vector.load %arg7[%c0_109, %c0_110] : memref<1x128xf32, #tpu.memory_space<vmem>>, vector<1x128xf32>
      %160 = vector.broadcast %159 : vector<1x128xf32> to vector<8x128xf32>
      %161 = arith.addf %158, %160 : vector<8x128xf32>
      %cst_111 = arith.constant 5.000000e-01 : f32
      %162 = arith.mulf %cst_111, %18 : f32
      %163 = vector.broadcast %162 : f32 to vector<8x128xf32>
      %164 = arith.mulf %163, %161 : vector<8x128xf32>
      %165 = arith.addf %150, %164 : vector<8x128xf32>
      %c0_112 = arith.constant 0 : index
      %c0_113 = arith.constant 0 : index
      %166 = vector.load %arg4[%c0_112, %c0_113] : memref<128x128xf32, #tpu.memory_space<vmem>>, vector<128x128xf32>
      %cst_114 = arith.constant dense<0.000000e+00> : vector<8x128xf32>
      %167 = tpu.matmul %165, %166, %cst_114 {dimension_numbers = #tpu.dot_dimension_numbers<[1], [0], [0], [1], [0, 0, 1, 1], [], []>} : vector<8x128xf32>, vector<128x128xf32>, vector<8x128xf32> -> vector<8x128xf32>
      %c0_115 = arith.constant 0 : index
      %c0_116 = arith.constant 0 : index
      %168 = vector.load %arg5[%c0_115, %c0_116] : memref<1x128xf32, #tpu.memory_space<vmem>>, vector<1x128xf32>
      %169 = vector.broadcast %168 : vector<1x128xf32> to vector<8x128xf32>
      %170 = arith.addf %167, %169 : vector<8x128xf32>
      %171 = math.tanh %170 : vector<8x128xf32>
      %c0_117 = arith.constant 0 : index
      %c0_118 = arith.constant 0 : index
      %172 = vector.load %arg6[%c0_117, %c0_118] : memref<128x128xf32, #tpu.memory_space<vmem>>, vector<128x128xf32>
      %cst_119 = arith.constant dense<0.000000e+00> : vector<8x128xf32>
      %173 = tpu.matmul %171, %172, %cst_119 {dimension_numbers = #tpu.dot_dimension_numbers<[1], [0], [0], [1], [0, 0, 1, 1], [], []>} : vector<8x128xf32>, vector<128x128xf32>, vector<8x128xf32> -> vector<8x128xf32>
      %c0_120 = arith.constant 0 : index
      %c0_121 = arith.constant 0 : index
      %174 = vector.load %arg7[%c0_120, %c0_121] : memref<1x128xf32, #tpu.memory_space<vmem>>, vector<1x128xf32>
      %175 = vector.broadcast %174 : vector<1x128xf32> to vector<8x128xf32>
      %176 = arith.addf %173, %175 : vector<8x128xf32>
      %cst_122 = arith.constant 5.000000e-01 : f32
      %177 = arith.mulf %cst_122, %18 : f32
      %178 = vector.broadcast %177 : f32 to vector<8x128xf32>
      %179 = arith.mulf %178, %176 : vector<8x128xf32>
      %180 = arith.addf %150, %179 : vector<8x128xf32>
      %c0_123 = arith.constant 0 : index
      %c0_124 = arith.constant 0 : index
      %181 = vector.load %arg4[%c0_123, %c0_124] : memref<128x128xf32, #tpu.memory_space<vmem>>, vector<128x128xf32>
      %cst_125 = arith.constant dense<0.000000e+00> : vector<8x128xf32>
      %182 = tpu.matmul %180, %181, %cst_125 {dimension_numbers = #tpu.dot_dimension_numbers<[1], [0], [0], [1], [0, 0, 1, 1], [], []>} : vector<8x128xf32>, vector<128x128xf32>, vector<8x128xf32> -> vector<8x128xf32>
      %c0_126 = arith.constant 0 : index
      %c0_127 = arith.constant 0 : index
      %183 = vector.load %arg5[%c0_126, %c0_127] : memref<1x128xf32, #tpu.memory_space<vmem>>, vector<1x128xf32>
      %184 = vector.broadcast %183 : vector<1x128xf32> to vector<8x128xf32>
      %185 = arith.addf %182, %184 : vector<8x128xf32>
      %186 = math.tanh %185 : vector<8x128xf32>
      %c0_128 = arith.constant 0 : index
      %c0_129 = arith.constant 0 : index
      %187 = vector.load %arg6[%c0_128, %c0_129] : memref<128x128xf32, #tpu.memory_space<vmem>>, vector<128x128xf32>
      %cst_130 = arith.constant dense<0.000000e+00> : vector<8x128xf32>
      %188 = tpu.matmul %186, %187, %cst_130 {dimension_numbers = #tpu.dot_dimension_numbers<[1], [0], [0], [1], [0, 0, 1, 1], [], []>} : vector<8x128xf32>, vector<128x128xf32>, vector<8x128xf32> -> vector<8x128xf32>
      %c0_131 = arith.constant 0 : index
      %c0_132 = arith.constant 0 : index
      %189 = vector.load %arg7[%c0_131, %c0_132] : memref<1x128xf32, #tpu.memory_space<vmem>>, vector<1x128xf32>
      %190 = vector.broadcast %189 : vector<1x128xf32> to vector<8x128xf32>
      %191 = arith.addf %188, %190 : vector<8x128xf32>
      %192 = vector.broadcast %18 : f32 to vector<8x128xf32>
      %193 = arith.mulf %192, %191 : vector<8x128xf32>
      %194 = arith.addf %150, %193 : vector<8x128xf32>
      %c0_133 = arith.constant 0 : index
      %c0_134 = arith.constant 0 : index
      %195 = vector.load %arg4[%c0_133, %c0_134] : memref<128x128xf32, #tpu.memory_space<vmem>>, vector<128x128xf32>
      %cst_135 = arith.constant dense<0.000000e+00> : vector<8x128xf32>
      %196 = tpu.matmul %194, %195, %cst_135 {dimension_numbers = #tpu.dot_dimension_numbers<[1], [0], [0], [1], [0, 0, 1, 1], [], []>} : vector<8x128xf32>, vector<128x128xf32>, vector<8x128xf32> -> vector<8x128xf32>
      %c0_136 = arith.constant 0 : index
      %c0_137 = arith.constant 0 : index
      %197 = vector.load %arg5[%c0_136, %c0_137] : memref<1x128xf32, #tpu.memory_space<vmem>>, vector<1x128xf32>
      %198 = vector.broadcast %197 : vector<1x128xf32> to vector<8x128xf32>
      %199 = arith.addf %196, %198 : vector<8x128xf32>
      %200 = math.tanh %199 : vector<8x128xf32>
      %c0_138 = arith.constant 0 : index
      %c0_139 = arith.constant 0 : index
      %201 = vector.load %arg6[%c0_138, %c0_139] : memref<128x128xf32, #tpu.memory_space<vmem>>, vector<128x128xf32>
      %cst_140 = arith.constant dense<0.000000e+00> : vector<8x128xf32>
      %202 = tpu.matmul %200, %201, %cst_140 {dimension_numbers = #tpu.dot_dimension_numbers<[1], [0], [0], [1], [0, 0, 1, 1], [], []>} : vector<8x128xf32>, vector<128x128xf32>, vector<8x128xf32> -> vector<8x128xf32>
      %c0_141 = arith.constant 0 : index
      %c0_142 = arith.constant 0 : index
      %203 = vector.load %arg7[%c0_141, %c0_142] : memref<1x128xf32, #tpu.memory_space<vmem>>, vector<1x128xf32>
      %204 = vector.broadcast %203 : vector<1x128xf32> to vector<8x128xf32>
      %205 = arith.addf %202, %204 : vector<8x128xf32>
      %cst_143 = arith.constant 6.000000e+00 : f32
      %206 = arith.divf %18, %cst_143 : f32
      %cst_144 = arith.constant 2.000000e+00 : f32
      %207 = vector.broadcast %cst_144 : f32 to vector<8x128xf32>
      %208 = arith.mulf %207, %176 : vector<8x128xf32>
      %209 = arith.addf %161, %208 : vector<8x128xf32>
      %cst_145 = arith.constant 2.000000e+00 : f32
      %210 = vector.broadcast %cst_145 : f32 to vector<8x128xf32>
      %211 = arith.mulf %210, %191 : vector<8x128xf32>
      %212 = arith.addf %209, %211 : vector<8x128xf32>
      %213 = arith.addf %212, %205 : vector<8x128xf32>
      %214 = vector.broadcast %206 : f32 to vector<8x128xf32>
      %215 = arith.mulf %214, %213 : vector<8x128xf32>
      %216 = arith.addf %150, %215 : vector<8x128xf32>
      %c3_i32 = arith.constant 3 : i32
      %c0_146 = arith.constant 0 : index
      %c0_147 = arith.constant 0 : index
      %217 = vector.load %arg4[%c0_146, %c0_147] : memref<128x128xf32, #tpu.memory_space<vmem>>, vector<128x128xf32>
      %cst_148 = arith.constant dense<0.000000e+00> : vector<8x128xf32>
      %218 = tpu.matmul %216, %217, %cst_148 {dimension_numbers = #tpu.dot_dimension_numbers<[1], [0], [0], [1], [0, 0, 1, 1], [], []>} : vector<8x128xf32>, vector<128x128xf32>, vector<8x128xf32> -> vector<8x128xf32>
      %c0_149 = arith.constant 0 : index
      %c0_150 = arith.constant 0 : index
      %219 = vector.load %arg5[%c0_149, %c0_150] : memref<1x128xf32, #tpu.memory_space<vmem>>, vector<1x128xf32>
      %220 = vector.broadcast %219 : vector<1x128xf32> to vector<8x128xf32>
      %221 = arith.addf %218, %220 : vector<8x128xf32>
      %222 = math.tanh %221 : vector<8x128xf32>
      %c0_151 = arith.constant 0 : index
      %c0_152 = arith.constant 0 : index
      %223 = vector.load %arg6[%c0_151, %c0_152] : memref<128x128xf32, #tpu.memory_space<vmem>>, vector<128x128xf32>
      %cst_153 = arith.constant dense<0.000000e+00> : vector<8x128xf32>
      %224 = tpu.matmul %222, %223, %cst_153 {dimension_numbers = #tpu.dot_dimension_numbers<[1], [0], [0], [1], [0, 0, 1, 1], [], []>} : vector<8x128xf32>, vector<128x128xf32>, vector<8x128xf32> -> vector<8x128xf32>
      %c0_154 = arith.constant 0 : index
      %c0_155 = arith.constant 0 : index
      %225 = vector.load %arg7[%c0_154, %c0_155] : memref<1x128xf32, #tpu.memory_space<vmem>>, vector<1x128xf32>
      %226 = vector.broadcast %225 : vector<1x128xf32> to vector<8x128xf32>
      %227 = arith.addf %224, %226 : vector<8x128xf32>
      %cst_156 = arith.constant 5.000000e-01 : f32
      %228 = arith.mulf %cst_156, %18 : f32
      %229 = vector.broadcast %228 : f32 to vector<8x128xf32>
      %230 = arith.mulf %229, %227 : vector<8x128xf32>
      %231 = arith.addf %216, %230 : vector<8x128xf32>
      %c0_157 = arith.constant 0 : index
      %c0_158 = arith.constant 0 : index
      %232 = vector.load %arg4[%c0_157, %c0_158] : memref<128x128xf32, #tpu.memory_space<vmem>>, vector<128x128xf32>
      %cst_159 = arith.constant dense<0.000000e+00> : vector<8x128xf32>
      %233 = tpu.matmul %231, %232, %cst_159 {dimension_numbers = #tpu.dot_dimension_numbers<[1], [0], [0], [1], [0, 0, 1, 1], [], []>} : vector<8x128xf32>, vector<128x128xf32>, vector<8x128xf32> -> vector<8x128xf32>
      %c0_160 = arith.constant 0 : index
      %c0_161 = arith.constant 0 : index
      %234 = vector.load %arg5[%c0_160, %c0_161] : memref<1x128xf32, #tpu.memory_space<vmem>>, vector<1x128xf32>
      %235 = vector.broadcast %234 : vector<1x128xf32> to vector<8x128xf32>
      %236 = arith.addf %233, %235 : vector<8x128xf32>
      %237 = math.tanh %236 : vector<8x128xf32>
      %c0_162 = arith.constant 0 : index
      %c0_163 = arith.constant 0 : index
      %238 = vector.load %arg6[%c0_162, %c0_163] : memref<128x128xf32, #tpu.memory_space<vmem>>, vector<128x128xf32>
      %cst_164 = arith.constant dense<0.000000e+00> : vector<8x128xf32>
      %239 = tpu.matmul %237, %238, %cst_164 {dimension_numbers = #tpu.dot_dimension_numbers<[1], [0], [0], [1], [0, 0, 1, 1], [], []>} : vector<8x128xf32>, vector<128x128xf32>, vector<8x128xf32> -> vector<8x128xf32>
      %c0_165 = arith.constant 0 : index
      %c0_166 = arith.constant 0 : index
      %240 = vector.load %arg7[%c0_165, %c0_166] : memref<1x128xf32, #tpu.memory_space<vmem>>, vector<1x128xf32>
      %241 = vector.broadcast %240 : vector<1x128xf32> to vector<8x128xf32>
      %242 = arith.addf %239, %241 : vector<8x128xf32>
      %cst_167 = arith.constant 5.000000e-01 : f32
      %243 = arith.mulf %cst_167, %18 : f32
      %244 = vector.broadcast %243 : f32 to vector<8x128xf32>
      %245 = arith.mulf %244, %242 : vector<8x128xf32>
      %246 = arith.addf %216, %245 : vector<8x128xf32>
      %c0_168 = arith.constant 0 : index
      %c0_169 = arith.constant 0 : index
      %247 = vector.load %arg4[%c0_168, %c0_169] : memref<128x128xf32, #tpu.memory_space<vmem>>, vector<128x128xf32>
      %cst_170 = arith.constant dense<0.000000e+00> : vector<8x128xf32>
      %248 = tpu.matmul %246, %247, %cst_170 {dimension_numbers = #tpu.dot_dimension_numbers<[1], [0], [0], [1], [0, 0, 1, 1], [], []>} : vector<8x128xf32>, vector<128x128xf32>, vector<8x128xf32> -> vector<8x128xf32>
      %c0_171 = arith.constant 0 : index
      %c0_172 = arith.constant 0 : index
      %249 = vector.load %arg5[%c0_171, %c0_172] : memref<1x128xf32, #tpu.memory_space<vmem>>, vector<1x128xf32>
      %250 = vector.broadcast %249 : vector<1x128xf32> to vector<8x128xf32>
      %251 = arith.addf %248, %250 : vector<8x128xf32>
      %252 = math.tanh %251 : vector<8x128xf32>
      %c0_173 = arith.constant 0 : index
      %c0_174 = arith.constant 0 : index
      %253 = vector.load %arg6[%c0_173, %c0_174] : memref<128x128xf32, #tpu.memory_space<vmem>>, vector<128x128xf32>
      %cst_175 = arith.constant dense<0.000000e+00> : vector<8x128xf32>
      %254 = tpu.matmul %252, %253, %cst_175 {dimension_numbers = #tpu.dot_dimension_numbers<[1], [0], [0], [1], [0, 0, 1, 1], [], []>} : vector<8x128xf32>, vector<128x128xf32>, vector<8x128xf32> -> vector<8x128xf32>
      %c0_176 = arith.constant 0 : index
      %c0_177 = arith.constant 0 : index
      %255 = vector.load %arg7[%c0_176, %c0_177] : memref<1x128xf32, #tpu.memory_space<vmem>>, vector<1x128xf32>
      %256 = vector.broadcast %255 : vector<1x128xf32> to vector<8x128xf32>
      %257 = arith.addf %254, %256 : vector<8x128xf32>
      %258 = vector.broadcast %18 : f32 to vector<8x128xf32>
      %259 = arith.mulf %258, %257 : vector<8x128xf32>
      %260 = arith.addf %216, %259 : vector<8x128xf32>
      %c0_178 = arith.constant 0 : index
      %c0_179 = arith.constant 0 : index
      %261 = vector.load %arg4[%c0_178, %c0_179] : memref<128x128xf32, #tpu.memory_space<vmem>>, vector<128x128xf32>
      %cst_180 = arith.constant dense<0.000000e+00> : vector<8x128xf32>
      %262 = tpu.matmul %260, %261, %cst_180 {dimension_numbers = #tpu.dot_dimension_numbers<[1], [0], [0], [1], [0, 0, 1, 1], [], []>} : vector<8x128xf32>, vector<128x128xf32>, vector<8x128xf32> -> vector<8x128xf32>
      %c0_181 = arith.constant 0 : index
      %c0_182 = arith.constant 0 : index
      %263 = vector.load %arg5[%c0_181, %c0_182] : memref<1x128xf32, #tpu.memory_space<vmem>>, vector<1x128xf32>
      %264 = vector.broadcast %263 : vector<1x128xf32> to vector<8x128xf32>
      %265 = arith.addf %262, %264 : vector<8x128xf32>
      %266 = math.tanh %265 : vector<8x128xf32>
      %c0_183 = arith.constant 0 : index
      %c0_184 = arith.constant 0 : index
      %267 = vector.load %arg6[%c0_183, %c0_184] : memref<128x128xf32, #tpu.memory_space<vmem>>, vector<128x128xf32>
      %cst_185 = arith.constant dense<0.000000e+00> : vector<8x128xf32>
      %268 = tpu.matmul %266, %267, %cst_185 {dimension_numbers = #tpu.dot_dimension_numbers<[1], [0], [0], [1], [0, 0, 1, 1], [], []>} : vector<8x128xf32>, vector<128x128xf32>, vector<8x128xf32> -> vector<8x128xf32>
      %c0_186 = arith.constant 0 : index
      %c0_187 = arith.constant 0 : index
      %269 = vector.load %arg7[%c0_186, %c0_187] : memref<1x128xf32, #tpu.memory_space<vmem>>, vector<1x128xf32>
      %270 = vector.broadcast %269 : vector<1x128xf32> to vector<8x128xf32>
      %271 = arith.addf %268, %270 : vector<8x128xf32>
      %cst_188 = arith.constant 6.000000e+00 : f32
      %272 = arith.divf %18, %cst_188 : f32
      %cst_189 = arith.constant 2.000000e+00 : f32
      %273 = vector.broadcast %cst_189 : f32 to vector<8x128xf32>
      %274 = arith.mulf %273, %242 : vector<8x128xf32>
      %275 = arith.addf %227, %274 : vector<8x128xf32>
      %cst_190 = arith.constant 2.000000e+00 : f32
      %276 = vector.broadcast %cst_190 : f32 to vector<8x128xf32>
      %277 = arith.mulf %276, %257 : vector<8x128xf32>
      %278 = arith.addf %275, %277 : vector<8x128xf32>
      %279 = arith.addf %278, %271 : vector<8x128xf32>
      %280 = vector.broadcast %272 : f32 to vector<8x128xf32>
      %281 = arith.mulf %280, %279 : vector<8x128xf32>
      %282 = arith.addf %216, %281 : vector<8x128xf32>
      %c4_i32_191 = arith.constant 4 : i32
      %283 = arith.index_cast %arg10 : i32 to index
      %c0_192 = arith.constant 0 : index
      %c0_193 = arith.constant 0 : index
      %284 = vector.load %arg8[%283, %c0_192, %c0_193] : memref<4x8x128xf32, #tpu.memory_space<vmem>>, vector<1x8x128xf32>
      %285 = vector.shape_cast %284 : vector<1x8x128xf32> to vector<8x128xf32>
      %286 = vector.shape_cast %282 : vector<8x128xf32> to vector<1x8x128xf32>
      tpu.vector_store %arg8[%283, %c0_192, %c0_193], %286 {strides = array<i32>} : memref<4x8x128xf32, #tpu.memory_space<vmem>>, vector<1x8x128xf32>,
      scf.yield %282 : vector<8x128xf32>
    }
    %c0_5 = arith.constant 0 : index
    %c0_6 = arith.constant 0 : index
    %9 = vector.load %arg9[%c0_5, %c0_6] : memref<8x128xf32, #tpu.memory_space<vmem>>, vector<8x128xf32>
    tpu.vector_store %arg9[%c0_5, %c0_6], %8 {strides = array<i32>} : memref<8x128xf32, #tpu.memory_space<vmem>>, vector<8x128xf32>,
    return
  }
  func.func @transform_0(%arg0: i32, %arg1: i32, %arg2: memref<8xf32, #tpu.memory_space<smem>>) -> (i32, i32) {
    %c0_i32 = arith.constant 0 : i32
    %c0_i32_0 = arith.constant 0 : i32
    return %arg0, %c0_i32 : i32, i32
  }
  func.func @transform_1(%arg0: i32, %arg1: i32, %arg2: memref<8xf32, #tpu.memory_space<smem>>) -> (i32, i32) {
    %c0_i32 = arith.constant 0 : i32
    %c0_i32_0 = arith.constant 0 : i32
    %c0_i32_1 = arith.constant 0 : i32
    return %c0_i32, %c0_i32_0 : i32, i32
  }
  func.func @transform_2(%arg0: i32, %arg1: i32, %arg2: memref<8xf32, #tpu.memory_space<smem>>) -> (i32, i32) {
    %c0_i32 = arith.constant 0 : i32
    %c0_i32_0 = arith.constant 0 : i32
    %c0_i32_1 = arith.constant 0 : i32
    return %c0_i32, %c0_i32_0 : i32, i32
  }
  func.func @transform_3(%arg0: i32, %arg1: i32, %arg2: memref<8xf32, #tpu.memory_space<smem>>) -> (i32, i32) {
    %c0_i32 = arith.constant 0 : i32
    %c0_i32_0 = arith.constant 0 : i32
    %c0_i32_1 = arith.constant 0 : i32
    return %c0_i32, %c0_i32_0 : i32, i32
  }
  func.func @transform_4(%arg0: i32, %arg1: i32, %arg2: memref<8xf32, #tpu.memory_space<smem>>) -> (i32, i32) {
    %c0_i32 = arith.constant 0 : i32
    %c0_i32_0 = arith.constant 0 : i32
    %c0_i32_1 = arith.constant 0 : i32
    return %c0_i32, %c0_i32_0 : i32, i32
  }
  func.func @transform_5(%arg0: i32, %arg1: i32, %arg2: memref<8xf32, #tpu.memory_space<smem>>) -> (i32, i32, i32) {
    %c0_i32 = arith.constant 0 : i32
    %c0_i32_0 = arith.constant 0 : i32
    return %arg1, %arg0, %c0_i32 : i32, i32, i32
  }
}

</mosaic_0001>

<bundles_post_ra>
// kernel: tpu_custom_call.1
= control target key start
LH: loop header
LB: loop body
LE: loop exit
PB: predicated region body
PF: predicated region fallthrough
CT: control target
= control target key end

     0   :  { %s6611_s0 = inlined_call_operand.hbm [shape: f32[8], index: 0, kind: input, shape index: {}]   ;;  %s6612_s1 = inlined_call_operand.hbm [shape: f32[8,128], index: 1, kind: input, shape index: {}]   ;;  %s6613_s2 = inlined_call_operand.hbm [shape: f32[128,128], index: 2, kind: input, shape index: {}]   ;;  %s6614_s3 = inlined_call_operand.vmem [shape: f32[1,128], index: 3, kind: input, shape index: {}]   ;;  %s6615_s4 = inlined_call_operand.hbm [shape: f32[128,128], index: 4, kind: input, shape index: {}]   ;;  %s6616_s5 = inlined_call_operand.vmem [shape: f32[1,128], index: 5, kind: input, shape index: {}]   ;;  %s6617_s6 = inlined_call_operand.hbm [shape: f32[8,8,128], index: 6, kind: output, shape index: {}]  }
   0x1   :  { %s5387_s23 = scalar_lea.hbm %s6611_s0, 16 }
   0x2   :  { %p5388_p0 = scmp.ne.s32.totalorder %s6611_s0, %s5387_s23  ;;  %p5391_p1 = scmp.lt.u32.totalorder %s5387_s23, %s6611_s0 }
   0x4   :  { %p5393_p2 = pnand %p5391_p1, %p5388_p0 }
   0x6   :  { %5396 = shalt.err (!%p5393_p2)  }
   0x7   :  { %s5592_s28 = smov [#allocation4]  }
   0x8   :  { %12 = dma.hbm_to_smem %s6611_s0, 16, %s5592_s28, [#allocation3] }
   0x9   :  { %5546 = dma.done.wait [#allocation3], 16 }
   0xa   :  { %5547 = vsyncadd [#allocation3], 4294967280 }
   0xb   :  { %14 = sfence }
   0xc   :  { %15 = vsyncpa [#allocation6], 0 }
   0xd   :  { %16 = vsyncpa [#allocation9], 0 }
   0xe   :  { %17 = vsyncpa [#allocation7], 0 }
   0xf   :  { %19 = vsyncpa [#allocation7 + $0x1], 0  ;;  %s5651_s7 = smov 0   ;;  %s5653_s8 = smov 0  }
  0x10   :  { %s5655_s9 = smov 0   ;;  %s5657_s10 = smov 0  }
  0x11   :  { %s5659_s11 = smov 0   ;;  %s5661_s12 = smov 0  }
  0x12 LB: > { %6625 = sst [smem:[#allocation16_spill]] %s5578_s11  ;;  %s2780_s0 = sadd.s32 4294967295, %s5582_s12   ;;  %s5582_s12 = sphi %s5661_s12, %s25_s12   ;;  %s5578_s11 = sphi %s5659_s11, %s6640_s11   ;;  %s5574_s10 = sphi %s5657_s10, %s6639_s10   ;;  %s5570_s9 = sphi %s5655_s9, %s6643_s9   ;;  %s5566_s8 = sphi %s5653_s8, %s6642_s8   ;;  %s5562_s7 = sphi %s5651_s7, %s6641_s7  }
  0x13   : > { %s2781_s13 = sadd.s32 4294967294, %s5582_s12   ;;  %s34_s14 = sadd.s32 1, %s5578_s11 }
  0x14   : > { %s156_s15 = sadd.s32 1, %s5570_s9  ;;  %p35_p3 = scmp.ge.s32.totalorder %s34_s14, 2 }
  0x15   : > { %p166_p4 = scmp.ne.s32.totalorder %s5570_s9, %s5566_s8  ;;  %p167_p5 = scmp.eq.s32.totalorder %s2780_s0, 1 }
  0x16   : > { %p172_p6 = scmp.ne.s32.totalorder %s5566_s8, %s5562_s7  ;;  %s6645_s14 = smov (%p35_p3, %s34_s14), 0 }
  0x17   : > { %6626 = sst [smem:[#allocation17_spill]] %s6645_s14  ;;  %p5691_p7 = por %p167_p5, %p166_p4 }
  0x18   : > { %p173_p8 = scmp.eq.s32.totalorder %s2781_s13, 1  ;;  %s151_s17 = ssub.s32 %s5578_s11, %s6645_s14 }
  0x19   : > { %s6627_s16 = scalar_select %p5691_p7, 1, 0 }
  0x1a   : > { %p2782_p9 = scmp.ge.s32.totalorder %s5582_s12, 1  ;;  %p154_p10 = scmp.eq.s32.totalorder %s151_s17, 0 }
  0x1b   : > { %p5698_p11 = por %p173_p8, %p172_p6  ;;  %p180_p12 = scmp.lt.s32.totalorder %s5582_s12, 3 }
  0x1c   : > { %s5704_s19 = scalar_select %p154_p10, %s5570_s9, %s156_s15  }
  0x1d   : > { %s6628_s18 = scalar_select %p5698_p11, 1, 0 }
  0x1e   : > { %p5706_p13 = pnand %p2782_p9, %p180_p12  ;;  %p5710_p0 = scmp.eq.s32.totalorder %s2780_s0, 0 }
  0x1f   : > { %s5593_s22 = smov [#allocation8]   ;;  %s5594_s25 = smov [#allocation5]  }
  0x20   : > { %s6629_s20 = scalar_select %p5706_p13, 1, 0 }
  0x21   : > { %s6630_s21 = scalar_select %p5710_p0, 1, 0 }
  0x22   : > { %p5249_p1 = pneg %p5706_p13  ;;  %s205_s23 = sshll.u32 %s5593_s22, 4  ;;  %s206_s23 = int_to_ptr.vmem [resolvable:$true] %s205_s23 }
  0x23   : > { %s195_s26 = sshll.u32 %s5594_s25, 4  ;;  %s5397_s29 = scalar_lea.hbm %s6613_s2, 2048  ;;  %s196_s26 = int_to_ptr.vmem [resolvable:$true] %s195_s26 }
  0x24   : > { %p5718_p2 = pnand %p5710_p0, %p5249_p1  ;;  %p5398_p3 = scmp.ne.s32.totalorder %s6613_s2, %s5397_s29 }
  0x25   : > { %p5404_p8 = scmp.lt.u32.totalorder %s5397_s29, %s6613_s2 }
  0x26   : > { %p5730_p4 = pneg %p5718_p2 }
  0x28   : > { %p5400_p5 = pnand %p5730_p4, %p5398_p3 }
  0x2a   : > { %p5401_p6 = pneg %p5400_p5 }
  0x2c   : > { %p5406_p9 = pnand %p5404_p8, %p5401_p6 }
  0x2e   : > { %5409 = shalt.err (!%p5406_p9)
}
  0x2f   : > { %s5410_s22 = scalar_lea.vmem %s206_s23, 2048  ;;  %p5418_p11 = scmp.lt.s32.totalorder %s206_s23, %s206_s23 }
  0x30   : > { %p5411_p10 = scmp.ne.s32.totalorder %s206_s23, %s5410_s22  ;;  %p5419_p7 = scmp.lt.s32.totalorder %s5410_s22, %s5410_s22 }
  0x32   : > { %p5413_p12 = pnand %p5411_p10, %p5730_p4  ;;  %p5420_p0 = por %p5419_p7, %p5418_p11 }
  0x34   : > { %p5414_p1 = pneg %p5413_p12 }
  0x36   : > { %p5421_p13 = pnand %p5420_p0, %p5414_p1 }
  0x38   : > { %5424 = shalt.err (!%p5421_p13)
}
  0x39   : > { %s6624_s25 = smov 128   ;;  %s5596_s27 = smov 8  }
  0x3a   : > { %5255 = dma.hbm_to_vmem [thread:$0]  (!%p5718_p2), %s6613_s2, 2048, %s206_s23, [#allocation9], %s6624_s25, %s6624_s25, %s5596_s27  }
  0x3b   : > { %s5425_s15 = scalar_lea.hbm %s6612_s1, 128 }
  0x3c   : > { %p5426_p7 = scmp.ne.s32.totalorder %s6612_s1, %s5425_s15  ;;  %p5432_p0 = scmp.lt.u32.totalorder %s5425_s15, %s6612_s1 }
  0x3e   : > { %p5428_p11 = pnand %p5426_p7, %p5730_p4 }
  0x40   : > { %p5429_p13 = pneg %p5428_p11 }
  0x42   : > { %p5434_p3 = pnand %p5432_p0, %p5429_p13 }
  0x44   : > { %5437 = shalt.err (!%p5434_p3)
}
  0x45   : > { %s5438_s28 = scalar_lea.vmem %s196_s26, 128  ;;  %p5446_p9 = scmp.lt.s32.totalorder %s196_s26, %s196_s26 }
  0x46   : > { %p5439_p5 = scmp.ne.s32.totalorder %s196_s26, %s5438_s28  ;;  %p5447_p10 = scmp.lt.s32.totalorder %s5438_s28, %s5438_s28 }
  0x48   : > { %p5441_p6 = pnand %p5439_p5, %p5730_p4  ;;  %p5448_p12 = por %p5447_p10, %p5446_p9 }
  0x4a   : > { %p5442_p8 = pneg %p5441_p6 }
  0x4c   : > { %p5449_p1 = pnand %p5448_p12, %p5442_p8 }
  0x4e   : > { %5452 = shalt.err (!%p5449_p1)
}
  0x4f   : > { %5252 = dma.hbm_to_vmem [thread:$0]  (!%p5718_p2), %s6612_s1, 128, %s196_s26, [#allocation6]  }
  0x50   : > { %s5597_s11 = smov [#allocation10]   ;;  %s5453_s15 = scalar_lea.hbm %s6615_s4, 2048 }
  0x51   : > { %s221_s14 = sshll.u32 %s5597_s11, 4  ;;  %p5454_p7 = scmp.ne.s32.totalorder %s6615_s4, %s5453_s15  ;;  %s222_s14 = int_to_ptr.vmem [resolvable:$true] %s221_s14 }
  0x52   : > { %p5460_p0 = scmp.lt.u32.totalorder %s5453_s15, %s6615_s4 }
  0x53   : > { %p5456_p11 = pnand %p5454_p7, %p5730_p4 }
  0x55   : > { %p5457_p13 = pneg %p5456_p11 }
  0x57   : > { %p5462_p3 = pnand %p5460_p0, %p5457_p13 }
  0x59   : > { %5465 = shalt.err (!%p5462_p3)
}
  0x5a   : > { %s5466_s26 = scalar_lea.vmem %s222_s14, 2048  ;;  %p5474_p9 = scmp.lt.s32.totalorder %s222_s14, %s222_s14 }
  0x5b   : > { %p5467_p5 = scmp.ne.s32.totalorder %s222_s14, %s5466_s26  ;;  %p5475_p10 = scmp.lt.s32.totalorder %s5466_s26, %s5466_s26 }
  0x5d   : > { %p5469_p6 = pnand %p5467_p5, %p5730_p4  ;;  %p5476_p12 = por %p5475_p10, %p5474_p9 }
  0x5f   : > { %p5470_p8 = pneg %p5469_p6 }
  0x61   : > { %p5477_p1 = pnand %p5476_p12, %p5470_p8 }
  0x63   : > { %5480 = shalt.err (!%p5477_p1)
}
  0x64   : > { %s6633_s23 = smov 128   ;;  %p6634_p7 = scmp.ne.s32.totalorder %s6629_s20, 0 }
  0x65   : > { %5258 = dma.hbm_to_vmem [thread:$0]  (!%p5718_p2), %s6615_s4, 2048, %s222_s14, [#allocation9], %s6633_s23, %s6633_s23, %s5596_s27  }
  0x66   : > { %240 = sbr.rel (%p6634_p7) target bundleno = 7268 (0x1c64), region = 40  ;;  %p6635_p4 = scmp.ne.s32.totalorder (!%p6634_p7), %s6630_s21, 0 }
  0x6d   : > { %5549 = dma.done.wait (%p6635_p4), [#allocation6], 128  }
  0x6e   : > { %5551 = vsyncadd (%p6635_p4), [#allocation6], 4294967168 }
  0x6f   : > { %5553 = dma.done.wait (%p6635_p4), [#allocation9], 4096  }
  0x70   : > { %5555 = vsyncadd (%p6635_p4), [#allocation9], 4294963200  ;;  %s268_s24 = sand.u32 1, %s5566_s8   ;;  %p272_p2 = scmp.eq.s32.totalorder %s5574_s10, 0 }
  0x71   : > { %s2790_s20 = sshll.u32 %s268_s24, 5  ;;  %p2791_p11 = scmp.ne.s32.totalorder %s5574_s10, 0 }
  0x72   : > { %s5802_s13 = scalar_lea.vmem [#allocation11], %s2790_s20  ;;  %v276_v0 = vld [vmem:[#allocation5] sm:$0xff] (!%p2791_p11) }
  0x73   : > { %275 = sbr.rel (%p2791_p11) target bundleno = 122 (0x7a), region = 56  ;;  %277 = vst [vmem:[#allocation2] sm:$0xff] (!%p2791_p11), %v276_v0  ;;  %278 = vst [vmem:[%s5802_s13] sm:$0xff] (!%p2791_p11), %v276_v0 }
  0x7a PF: > { %s279_s27 = scalar_select %p272_p2, 1, 0   ;;  %v280_v1 = vld [vmem:[#allocation2] sm:$0xff]  }
  0x7b LB: >> { %v297_v2 = vld [vmem:[#allocation8] sm:$0xff]  ;;  %v298_v3 = vld [vmem:[#allocation8 + $0x8] sm:$0xff]  ;;  %v299_v4 = vld [vmem:[#allocation8 + $0x10] sm:$0xff]  ;;  %v5598_v5 = vmov 0.0|0.0   ;;  %vm5599_vm0 = vmmov 0   ;;  %v5600_v8 = vmov 0.0   ;;  %s5590_s27 = sphi %s279_s27, %s284_s27   ;;  %v5586_v1 = vphi %v280_v1, %v6636_v1  }
  0x7c   : >> { %4467 = vmatprep.subr.bf16.mxu0 %v5598_v5  ;;  %v5817_v6 = vpack.c.bf16 %v298_v3, %v297_v2  ;;  %v300_v7 = vld [vmem:[#allocation8 + $0x18] sm:$0xff]  ;;  %3379 = vmatprep.mubr.msk.f32.mxu0 %vm5599_vm0, %v5600_v8  ;;  %v301_v10 = vld [vmem:[#allocation8 + $0x20] sm:$0xff]  ;;  %v302_v11 = vld [vmem:[#allocation8 + $0x28] sm:$0xff]  ;;  %s2792_s14 = sshll.u32 %s5574_s10, 2 }
  0x7d   : >> { %4491 = vmatprep.subr.bf16.mxu1 %v5598_v5  ;;  %3414 = vmatprep.mubr.msk.f32.mxu1 %vm5599_vm0, %v5600_v8  ;;  %v5825_v9 = vpack.c.bf16 %v300_v7, %v299_v4  ;;  %v391_v12 = vld [vmem:[#allocation10] sm:$0xff]  ;;  %v392_v13 = vld [vmem:[#allocation10 + $0x8] sm:$0xff]  ;;  %v393_v15 = vld [vmem:[#allocation10 + $0x10] sm:$0xff]  ;;  %v5831_v17 = vpack.c.bf16 %v302_v11, %v301_v10  ;;  %s289_s30 = sadd.s32 %s5590_s27, %s2792_s14 }
  0x7e   : >> { %4469 = vmatpush3.bf16.msra.mxu0 %v5817_v6  ;;  %v5828_v14 = vpack.c.bf16 %v392_v13, %v391_v12  ;;  %v394_v16 = vld [vmem:[#allocation10 + $0x18] sm:$0xff]  ;;  %v303_v18 = vld [vmem:[#allocation8 + $0x30] sm:$0xff]  ;;  %v395_v21 = vld [vmem:[#allocation10 + $0x20] sm:$0xff]  ;;  %s2793_s0 = sadd.s32 4294967295, %s289_s30  ;;  %s290_s15 = sld [smem:[#allocation4 + %s289_s30]] }
  0x7f   : >> { %4470 = vmatprep.subr.bf16.mxu0 %v5598_v5  ;;  %v304_v19 = vld [vmem:[#allocation8 + $0x38] sm:$0xff]  ;;  %v5835_v20 = vpack.c.bf16 %v394_v16, %v393_v15  ;;  %v396_v22 = vld [vmem:[#allocation10 + $0x28] sm:$0xff]  ;;  %v305_v24 = vld [vmem:[#allocation8 + $0x40] sm:$0xff]  ;;  %s292_s17 = sld [smem:[#allocation4 + %s2793_s0]]  ;;  %s2796_s30 = sshll.u32 %s5590_s27, 3 }
  0x80   : >> { %4493 = vmatpush3.bf16.msra.mxu1 %v5828_v14  ;;  %v5839_v23 = vpack.c.bf16 %v304_v19, %v303_v18  ;;  %v306_v25 = vld [vmem:[#allocation8 + $0x48] sm:$0xff]  ;;  %v5843_v26 = vpack.c.bf16 %v396_v22, %v395_v21  ;;  %v397_v27 = vld [vmem:[#allocation10 + $0x30] sm:$0xff]  ;;  %v398_v28 = vld [vmem:[#allocation10 + $0x38] sm:$0xff]  ;;  %s2659_s0 = scalar_lea.vmem %s5802_s13, %s2796_s30 [#allocation11]  ;;  %s284_s27 = sadd.s32 1, %s5590_s27  }
  0x81   : >> { %4494 = vmatprep.subr.bf16.mxu1 %v5598_v5  ;;  %v5847_v29 = vpack.c.bf16 %v306_v25, %v305_v24  ;;  %v307_v30 = vld [vmem:[#allocation8 + $0x50] sm:$0xff]  ;;  %v308_v31 = vld [vmem:[#allocation8 + $0x58] sm:$0xff]  ;;  %v5851_v32 = vpack.c.bf16 %v398_v28, %v397_v27  ;;  %v399_v33 = vld [vmem:[#allocation10 + $0x40] sm:$0xff]  ;;  %p283_p13 = scmp.ge.s32.totalorder %s284_s27, 4 }
  0x82   : >> { %4472 = vmatpush3.bf16.msra.mxu0 %v5825_v9  ;;  %v400_v34 = vld [vmem:[#allocation10 + $0x48] sm:$0xff]  ;;  %v5855_v35 = vpack.c.bf16 %v308_v31, %v307_v30  ;;  %v309_v36 = vld [vmem:[#allocation8 + $0x60] sm:$0xff]  ;;  %v311_v40 = vld [vmem:[#allocation8 + $0x70] sm:$0xff]  ;;  %s6565_s27 = scalar_lea.sflag (%p283_p13), [#allocation7], %s268_s24  ;;  %p6637_p3 = scmp.ne.s32.totalorder (%p283_p13), %s6627_s16, 0 }
  0x83   : >> { %4473 = vmatprep.subr.bf16.mxu0 %v5598_v5  ;;  %v310_v37 = vld [vmem:[#allocation8 + $0x68] sm:$0xff]  ;;  %v5859_v38 = vpack.c.bf16 %v400_v34, %v399_v33  ;;  %v312_v41 = vld [vmem:[#allocation8 + $0x78] sm:$0xff]  ;;  %v401_v43 = vld [vmem:[#allocation10 + $0x50] sm:$0xff] }
  0x84   : >> { %4496 = vmatpush3.bf16.msra.mxu1 %v5835_v20  ;;  %v5863_v39 = vpack.c.bf16 %v310_v37, %v309_v36  ;;  %v5869_v42 = vpack.c.bf16 %v312_v41, %v311_v40  ;;  %v402_v44 = vld [vmem:[#allocation10 + $0x58] sm:$0xff]  ;;  %v403_v46 = vld [vmem:[#allocation10 + $0x60] sm:$0xff]  ;;  %v404_v47 = vld [vmem:[#allocation10 + $0x68] sm:$0xff] }
  0x85   : >> { %4497 = vmatprep.subr.bf16.mxu1 %v5598_v5  ;;  %v5893_v45 = vpack.c.bf16 %v402_v44, %v401_v43  ;;  %v5897_v48 = vpack.c.bf16 %v404_v47, %v403_v46  ;;  %v405_v49 = vld [vmem:[#allocation10 + $0x70] sm:$0xff]  ;;  %v406_v50 = vld [vmem:[#allocation10 + $0x78] sm:$0xff]  ;;  %s293_s22 = ssub.f32 %s290_s15, %s292_s17  ;;  %s2802_s15 = sshll.u32 (%p283_p13), %s5574_s10, 9 }
  0x86   : >> { %4475 = vmatpush3.bf16.msra.mxu0 %v5831_v17  ;;  %v5900_v51 = vpack.c.bf16 %v406_v50, %v405_v49  ;;  %v5908_v52 = vld [vmem:[%s6614_s3] ss:$0 sm:$0xff]  ;;  %s5601_s10 = smov (%p283_p13), [#allocation11]  }
  0x87   : >> { %4476 = vmatprep.subr.bf16.mxu0 %v5598_v5  ;;  %s5931_s28 = smul.f32 0.25, %s293_s22  ;;  %v5937_v57 = vld [vmem:[%s6616_s5] ss:$0 sm:$0xff]  ;;  %s5485_s25 = sshll.u32 (%p283_p13), %s5601_s10, 4  ;;  %s5486_s25 = int_to_ptr.vmem [resolvable:$false] %s5485_s25 }
  0x88   : >> { %4499 = vmatpush3.bf16.msra.mxu1 %v5843_v26 }
  0x89   : >> { %4500 = vmatprep.subr.bf16.mxu1 %v5598_v5  ;;  %s484_s26 = smul.f32 0.5, %s5931_s28  ;;  %v6025_v24 = vstv %s5931_s28 }
  0x8a   : >> { %4478 = vmatpush3.bf16.msra.mxu0 %v5839_v23  ;;  %s918_s29 = smul.f32 0.16666667, %s5931_s28  ;;  %s6558_s28 = scalar_lea.hbm (%p283_p13), %s6617_s6, %s2802_s15 }
  0x8b   : >> { %4479 = vmatprep.subr.bf16.mxu0 %v5598_v5  ;;  %v5939_v59 = vstv %s484_s26  ;;  %s2677_s26 = sshll.u32 (%p283_p13), %s5802_s13, 4  ;;  %s6561_s26 = int_to_ptr.vmem [resolvable:$true] %s2677_s26 }
  0x8c   : >> { %4502 = vmatpush3.bf16.msra.mxu1 %v5851_v32  ;;  %v6070_v47 = vstv %s918_s29  ;;  %s5481_s23 = scalar_lea.vmem (%p283_p13), %s6561_s26, 512  ;;  %s5487_s29 = scalar_lea.vmem (%p283_p13), %s5486_s25, 1024 }
  0x8d   : >> { %4503 = vmatprep.subr.bf16.mxu1 %v5598_v5  ;;  %p5482_p0 = scmp.ne.s32.totalorder (%p283_p13), %s6561_s26, %s5481_s23  ;;  %p5488_p8 = scmp.lt.s32.totalorder (%p283_p13), %s6561_s26, %s5486_s25 }
  0x8e   : >> { %4481 = vmatpush3.bf16.msra.mxu0 %v5847_v29  ;;  %p5489_p9 = scmp.lt.s32.totalorder (%p283_p13), %s5487_s29, %s5481_s23 }
  0x8f   : >> { %4482 = vmatprep.subr.bf16.mxu0 %v5598_v5  ;;  %p5483_p5 = pnand (%p283_p13), %p5482_p0, %p6637_p3 }
  0x90   : >> { %4505 = vmatpush3.bf16.msra.mxu1 %v5859_v38  ;;  %p5490_p10 = por (%p283_p13), %p5489_p9, %p5488_p8 }
  0x91   : >> { %4506 = vmatprep.subr.bf16.mxu1 %v5598_v5  ;;  %p5484_p6 = pneg (%p283_p13), %p5483_p5 }
  0x92   : >> { %4484 = vmatpush3.bf16.msra.mxu0 %v5855_v35 }
  0x93   : >> { %4485 = vmatprep.subr.bf16.mxu0 %v5598_v5  ;;  %p5491_p12 = pnand (%p283_p13), %p5490_p10, %p5484_p6 }
  0x94   : >> { %4508 = vmatpush3.bf16.msra.mxu1 %v5893_v45 }
  0x95   : >> { %4509 = vmatprep.subr.bf16.mxu1 %v5598_v5 }
  0x96   : >> { %4487 = vmatpush3.bf16.msra.mxu0 %v5863_v39 }
  0x97   : >> { %4488 = vmatprep.subr.bf16.mxu0 %v5598_v5 }
  0x98   : >> { %4511 = vmatpush3.bf16.msra.mxu1 %v5897_v48 }
  0x99   : >> { %4512 = vmatprep.subr.bf16.mxu1 %v5598_v5 }
  0x9a   : >> { %4490 = vmatpush3.bf16.msra.mxu0 %v5869_v42 }
  0x9b   : >> { %4515 = vmatprep.subr.bf16.mxu0 %v5598_v5 }
  0x9c   : >> { %4514 = vmatpush3.bf16.msra.mxu1 %v5900_v51 }
  0x9d   : >> { %3380 = vmatmul.mubr.f32.vlgmr.msra.gmra.mrb[0].mxu0 %v5586_v1  ;;  %4539 = vmatprep.subr.bf16.mxu1 %v5598_v5 }
  0x9e   : >> { %4517 = vmatpush3.bf16.msra.mxu0 %v5817_v6  ;;  %3449 = vmatprep.mubr.msk.f32.mxu0 %vm5599_vm0, %v5600_v8 }
  0x9f   : >> { %4518 = vmatprep.subr.bf16.mxu0 %v5598_v5 }
  0xa2   : >> { %4520 = vmatpush3.bf16.msra.mxu0 %v5825_v9 }
  0xa3   : >> { %4521 = vmatprep.subr.bf16.mxu0 %v5598_v5 }
  0xa6   : >> { %4523 = vmatpush3.bf16.msra.mxu0 %v5831_v17 }
  0xa7   : >> { %4524 = vmatprep.subr.bf16.mxu0 %v5598_v5 }
  0xaa   : >> { %4526 = vmatpush3.bf16.msra.mxu0 %v5839_v23 }
  0xab   : >> { %4527 = vmatprep.subr.bf16.mxu0 %v5598_v5 }
  0xae   : >> { %4529 = vmatpush3.bf16.msra.mxu0 %v5847_v29 }
  0xaf   : >> { %4530 = vmatprep.subr.bf16.mxu0 %v5598_v5 }
  0xb2   : >> { %4532 = vmatpush3.bf16.msra.mxu0 %v5855_v35 }
  0xb3   : >> { %4533 = vmatprep.subr.bf16.mxu0 %v5598_v5 }
  0xb6   : >> { %4535 = vmatpush3.bf16.msra.mxu0 %v5863_v39 }
  0xb7   : >> { %4536 = vmatprep.subr.bf16.mxu0 %v5598_v5 }
  0xba   : >> { %4538 = vmatpush3.bf16.msra.mxu0 %v5869_v42 }
  0xbb   : >> { %4563 = vmatprep.subr.bf16.mxu0 %v5598_v5 }
 0x170   : >> { %v386_v53 = vpop.f32.mrb[0].mxu0 }
 0x171   : >> { %v387_v54 = vadd.f32 %v5908_v52, %v386_v53  ;;  %v3381_v55 = vpop.f32.mrb[1].mxu0 }
 0x173   : >> { %5353 = vtanh.f32 %v387_v54 }
 0x17d   : >> { %v5354_v56 = vpop.eup %5353 }
 0x17e   : >> { %3415 = vmatmul.mubr.f32.vlgmr.msra.gmra.mrb[0].mxu1 %v5354_v56 }
 0x17f   : >> { %4541 = vmatpush3.bf16.msra.mxu1 %v5828_v14  ;;  %3484 = vmatprep.mubr.msk.f32.mxu1 %vm5599_vm0, %v5600_v8 }
 0x180   : >> { %4542 = vmatprep.subr.bf16.mxu1 %v5598_v5 }
 0x183   : >> { %4544 = vmatpush3.bf16.msra.mxu1 %v5835_v20 }
 0x184   : >> { %4545 = vmatprep.subr.bf16.mxu1 %v5598_v5 }
 0x187   : >> { %4547 = vmatpush3.bf16.msra.mxu1 %v5843_v26 }
 0x188   : >> { %4548 = vmatprep.subr.bf16.mxu1 %v5598_v5 }
 0x18b   : >> { %4550 = vmatpush3.bf16.msra.mxu1 %v5851_v32 }
 0x18c   : >> { %4551 = vmatprep.subr.bf16.mxu1 %v5598_v5 }
 0x18f   : >> { %4553 = vmatpush3.bf16.msra.mxu1 %v5859_v38 }
 0x190   : >> { %4554 = vmatprep.subr.bf16.mxu1 %v5598_v5 }
 0x193   : >> { %4556 = vmatpush3.bf16.msra.mxu1 %v5893_v45 }
 0x194   : >> { %4557 = vmatprep.subr.bf16.mxu1 %v5598_v5 }
 0x197   : >> { %4559 = vmatpush3.bf16.msra.mxu1 %v5897_v48 }
 0x198   : >> { %4560 = vmatprep.subr.bf16.mxu1 %v5598_v5 }
 0x19b   : >> { %4562 = vmatpush3.bf16.msra.mxu1 %v5900_v51 }
 0x19c   : >> { %4587 = vmatprep.subr.bf16.mxu1 %v5598_v5 }
 0x251   : >> { %v480_v58 = vpop.f32.mrb[0].mxu1 }
 0x252   : >> { %v5942_v60 = vadd.f32 %v5937_v57, %v480_v58  ;;  %v3416_v61 = vpop.f32.mrb[1].mxu1 }
 0x254   : >> { %v486_v62 = vmul.f32 %v5939_v59, %v5942_v60 }
 0x256   : >> { %v487_v63 = vadd.f32 %v5586_v1, %v486_v62 }
 0x258   : >> { %3450 = vmatmul.mubr.f32.vlgmr.msra.gmra.mrb[2].mxu0 %v487_v63 }
 0x259   : >> { %4565 = vmatpush3.bf16.msra.mxu0 %v5817_v6  ;;  %3519 = vmatprep.mubr.msk.f32.mxu0 %vm5599_vm0, %v5600_v8 }
 0x25a   : >> { %4566 = vmatprep.subr.bf16.mxu0 %v5598_v5 }
 0x25d   : >> { %4568 = vmatpush3.bf16.msra.mxu0 %v5825_v9 }
 0x25e   : >> { %4569 = vmatprep.subr.bf16.mxu0 %v5598_v5 }
 0x261   : >> { %4571 = vmatpush3.bf16.msra.mxu0 %v5831_v17 }
 0x262   : >> { %4572 = vmatprep.subr.bf16.mxu0 %v5598_v5 }
 0x265   : >> { %4574 = vmatpush3.bf16.msra.mxu0 %v5839_v23 }
 0x266   : >> { %4575 = vmatprep.subr.bf16.mxu0 %v5598_v5 }
 0x269   : >> { %4577 = vmatpush3.bf16.msra.mxu0 %v5847_v29 }
 0x26a   : >> { %4578 = vmatprep.subr.bf16.mxu0 %v5598_v5 }
 0x26d   : >> { %4580 = vmatpush3.bf16.msra.mxu0 %v5855_v35 }
 0x26e   : >> { %4581 = vmatprep.subr.bf16.mxu0 %v5598_v5 }
 0x271   : >> { %4583 = vmatpush3.bf16.msra.mxu0 %v5863_v39 }
 0x272   : >> { %4584 = vmatprep.subr.bf16.mxu0 %v5598_v5 }
 0x275   : >> { %4586 = vmatpush3.bf16.msra.mxu0 %v5869_v42 }
 0x276   : >> { %4611 = vmatprep.subr.bf16.mxu0 %v5598_v5 }
 0x32b   : >> { %v554_v0 = vpop.f32.mrb[2].mxu0 }
 0x32c   : >> { %v555_v2 = vadd.f32 %v5908_v52, %v554_v0  ;;  %v3451_v3 = vpop.f32.mrb[3].mxu0 }
 0x32e   : >> { %5355 = vtanh.f32 %v555_v2 }
 0x338   : >> { %v5356_v4 = vpop.eup %5355 }
 0x339   : >> { %3485 = vmatmul.mubr.f32.vlgmr.msra.gmra.mrb[2].mxu1 %v5356_v4 }
 0x33a   : >> { %4589 = vmatpush3.bf16.msra.mxu1 %v5828_v14  ;;  %3554 = vmatprep.mubr.msk.f32.mxu1 %vm5599_vm0, %v5600_v8 }
 0x33b   : >> { %4590 = vmatprep.subr.bf16.mxu1 %v5598_v5 }
 0x33e   : >> { %4592 = vmatpush3.bf16.msra.mxu1 %v5835_v20 }
 0x33f   : >> { %4593 = vmatprep.subr.bf16.mxu1 %v5598_v5 }
 0x342   : >> { %4595 = vmatpush3.bf16.msra.mxu1 %v5843_v26 }
 0x343   : >> { %4596 = vmatprep.subr.bf16.mxu1 %v5598_v5 }
 0x346   : >> { %4598 = vmatpush3.bf16.msra.mxu1 %v5851_v32 }
 0x347   : >> { %4599 = vmatprep.subr.bf16.mxu1 %v5598_v5 }
 0x34a   : >> { %4601 = vmatpush3.bf16.msra.mxu1 %v5859_v38 }
 0x34b   : >> { %4602 = vmatprep.subr.bf16.mxu1 %v5598_v5 }
 0x34e   : >> { %4604 = vmatpush3.bf16.msra.mxu1 %v5893_v45 }
 0x34f   : >> { %4605 = vmatprep.subr.bf16.mxu1 %v5598_v5 }
 0x352   : >> { %4607 = vmatpush3.bf16.msra.mxu1 %v5897_v48 }
 0x353   : >> { %4608 = vmatprep.subr.bf16.mxu1 %v5598_v5 }
 0x356   : >> { %4610 = vmatpush3.bf16.msra.mxu1 %v5900_v51 }
 0x357   : >> { %4635 = vmatprep.subr.bf16.mxu1 %v5598_v5 }
 0x40c   : >> { %v625_v7 = vpop.f32.mrb[2].mxu1 }
 0x40d   : >> { %v626_v10 = vadd.f32 %v5937_v57, %v625_v7  ;;  %v3486_v11 = vpop.f32.mrb[3].mxu1 }
 0x40f   : >> { %v629_v12 = vmul.f32 %v626_v10, %v5939_v59  ;;  %v919_v21 = vmul.f32 2.0, %v626_v10 }
 0x411   : >> { %v630_v13 = vadd.f32 %v5586_v1, %v629_v12  ;;  %v920_v28 = vadd.f32 %v919_v21, %v5942_v60 }
 0x413   : >> { %3520 = vmatmul.mubr.f32.vlgmr.msra.gmra.mrb[4].mxu0 %v630_v13 }
 0x414   : >> { %4613 = vmatpush3.bf16.msra.mxu0 %v5817_v6  ;;  %3589 = vmatprep.mubr.msk.f32.mxu0 %vm5599_vm0, %v5600_v8 }
 0x415   : >> { %4614 = vmatprep.subr.bf16.mxu0 %v5598_v5 }
 0x418   : >> { %4616 = vmatpush3.bf16.msra.mxu0 %v5825_v9 }
 0x419   : >> { %4617 = vmatprep.subr.bf16.mxu0 %v5598_v5 }
 0x41c   : >> { %4619 = vmatpush3.bf16.msra.mxu0 %v5831_v17 }
 0x41d   : >> { %4620 = vmatprep.subr.bf16.mxu0 %v5598_v5 }
 0x420   : >> { %4622 = vmatpush3.bf16.msra.mxu0 %v5839_v23 }
 0x421   : >> { %4623 = vmatprep.subr.bf16.mxu0 %v5598_v5 }
 0x424   : >> { %4625 = vmatpush3.bf16.msra.mxu0 %v5847_v29 }
 0x425   : >> { %4626 = vmatprep.subr.bf16.mxu0 %v5598_v5 }
 0x428   : >> { %4628 = vmatpush3.bf16.msra.mxu0 %v5855_v35 }
 0x429   : >> { %4629 = vmatprep.subr.bf16.mxu0 %v5598_v5 }
 0x42c   : >> { %4631 = vmatpush3.bf16.msra.mxu0 %v5863_v39 }
 0x42d   : >> { %4632 = vmatprep.subr.bf16.mxu0 %v5598_v5 }
 0x430   : >> { %4634 = vmatpush3.bf16.msra.mxu0 %v5869_v42 }
 0x431   : >> { %4659 = vmatprep.subr.bf16.mxu0 %v5598_v5 }
 0x4e6   : >> { %v697_v15 = vpop.f32.mrb[4].mxu0 }
 0x4e7   : >> { %v698_v16 = vadd.f32 %v5908_v52, %v697_v15  ;;  %v3521_v18 = vpop.f32.mrb[5].mxu0 }
 0x4e9   : >> { %5357 = vtanh.f32 %v698_v16 }
 0x4f3   : >> { %v5358_v19 = vpop.eup %5357 }
 0x4f4   : >> { %3555 = vmatmul.mubr.f32.vlgmr.msra.gmra.mrb[4].mxu1 %v5358_v19 }
 0x4f5   : >> { %4637 = vmatpush3.bf16.msra.mxu1 %v5828_v14  ;;  %3624 = vmatprep.mubr.msk.f32.mxu1 %vm5599_vm0, %v5600_v8 }
 0x4f6   : >> { %4638 = vmatprep.subr.bf16.mxu1 %v5598_v5 }
 0x4f9   : >> { %4640 = vmatpush3.bf16.msra.mxu1 %v5835_v20 }
 0x4fa   : >> { %4641 = vmatprep.subr.bf16.mxu1 %v5598_v5 }
 0x4fd   : >> { %4643 = vmatpush3.bf16.msra.mxu1 %v5843_v26 }
 0x4fe   : >> { %4644 = vmatprep.subr.bf16.mxu1 %v5598_v5 }
 0x501   : >> { %4646 = vmatpush3.bf16.msra.mxu1 %v5851_v32 }
 0x502   : >> { %4647 = vmatprep.subr.bf16.mxu1 %v5598_v5 }
 0x505   : >> { %4649 = vmatpush3.bf16.msra.mxu1 %v5859_v38 }
 0x506   : >> { %4650 = vmatprep.subr.bf16.mxu1 %v5598_v5 }
 0x509   : >> { %4652 = vmatpush3.bf16.msra.mxu1 %v5893_v45 }
 0x50a   : >> { %4653 = vmatprep.subr.bf16.mxu1 %v5598_v5 }
 0x50d   : >> { %4655 = vmatpush3.bf16.msra.mxu1 %v5897_v48 }
 0x50e   : >> { %4656 = vmatprep.subr.bf16.mxu1 %v5598_v5 }
 0x511   : >> { %4658 = vmatpush3.bf16.msra.mxu1 %v5900_v51 }
 0x512   : >> { %4683 = vmatprep.subr.bf16.mxu1 %v5598_v5 }
 0x5c7   : >> { %v768_v22 = vpop.f32.mrb[4].mxu1 }
 0x5c8   : >> { %v769_v25 = vadd.f32 %v5937_v57, %v768_v22  ;;  %v3556_v27 = vpop.f32.mrb[5].mxu1 }
 0x5ca   : >> { %v773_v30 = vmul.f32 %v6025_v24, %v769_v25  ;;  %v921_v31 = vmul.f32 2.0, %v769_v25 }
 0x5cc   : >> { %v774_v33 = vadd.f32 %v5586_v1, %v773_v30  ;;  %v922_v34 = vadd.f32 %v921_v31, %v920_v28 }
 0x5ce   : >> { %3590 = vmatmul.mubr.f32.vlgmr.msra.gmra.mrb[6].mxu0 %v774_v33 }
 0x5cf   : >> { %4661 = vmatpush3.bf16.msra.mxu0 %v5817_v6  ;;  %3659 = vmatprep.mubr.msk.f32.mxu0 %vm5599_vm0, %v5600_v8 }
 0x5d0   : >> { %4662 = vmatprep.subr.bf16.mxu0 %v5598_v5 }
 0x5d3   : >> { %4664 = vmatpush3.bf16.msra.mxu0 %v5825_v9 }
 0x5d4   : >> { %4665 = vmatprep.subr.bf16.mxu0 %v5598_v5 }
 0x5d7   : >> { %4667 = vmatpush3.bf16.msra.mxu0 %v5831_v17 }
 0x5d8   : >> { %4668 = vmatprep.subr.bf16.mxu0 %v5598_v5 }
 0x5db   : >> { %4670 = vmatpush3.bf16.msra.mxu0 %v5839_v23 }
 0x5dc   : >> { %4671 = vmatprep.subr.bf16.mxu0 %v5598_v5 }
 0x5df   : >> { %4673 = vmatpush3.bf16.msra.mxu0 %v5847_v29 }
 0x5e0   : >> { %4674 = vmatprep.subr.bf16.mxu0 %v5598_v5 }
 0x5e3   : >> { %4676 = vmatpush3.bf16.msra.mxu0 %v5855_v35 }
 0x5e4   : >> { %4677 = vmatprep.subr.bf16.mxu0 %v5598_v5 }
 0x5e7   : >> { %4679 = vmatpush3.bf16.msra.mxu0 %v5863_v39 }
 0x5e8   : >> { %4680 = vmatprep.subr.bf16.mxu0 %v5598_v5 }
 0x5eb   : >> { %4682 = vmatpush3.bf16.msra.mxu0 %v5869_v42 }
 0x5ec   : >> { %4707 = vmatprep.subr.bf16.mxu0 %v5598_v5 }
 0x6a1   : >> { %v841_v36 = vpop.f32.mrb[6].mxu0 }
 0x6a2   : >> { %v842_v37 = vadd.f32 %v5908_v52, %v841_v36  ;;  %v3591_v40 = vpop.f32.mrb[7].mxu0 }
 0x6a4   : >> { %5359 = vtanh.f32 %v842_v37 }
 0x6ae   : >> { %v5360_v41 = vpop.eup %5359 }
 0x6af   : >> { %3625 = vmatmul.mubr.f32.vlgmr.msra.gmra.mrb[6].mxu1 %v5360_v41 }
 0x6b0   : >> { %4685 = vmatpush3.bf16.msra.mxu1 %v5828_v14  ;;  %3694 = vmatprep.mubr.msk.f32.mxu1 %vm5599_vm0, %v5600_v8 }
 0x6b1   : >> { %4686 = vmatprep.subr.bf16.mxu1 %v5598_v5 }
 0x6b4   : >> { %4688 = vmatpush3.bf16.msra.mxu1 %v5835_v20 }
 0x6b5   : >> { %4689 = vmatprep.subr.bf16.mxu1 %v5598_v5 }
 0x6b8   : >> { %4691 = vmatpush3.bf16.msra.mxu1 %v5843_v26 }
 0x6b9   : >> { %4692 = vmatprep.subr.bf16.mxu1 %v5598_v5 }
 0x6bc   : >> { %4694 = vmatpush3.bf16.msra.mxu1 %v5851_v32 }
 0x6bd   : >> { %4695 = vmatprep.subr.bf16.mxu1 %v5598_v5 }
 0x6c0   : >> { %4697 = vmatpush3.bf16.msra.mxu1 %v5859_v38 }
 0x6c1   : >> { %4698 = vmatprep.subr.bf16.mxu1 %v5598_v5 }
 0x6c4   : >> { %4700 = vmatpush3.bf16.msra.mxu1 %v5893_v45 }
 0x6c5   : >> { %4701 = vmatprep.subr.bf16.mxu1 %v5598_v5 }
 0x6c8   : >> { %4703 = vmatpush3.bf16.msra.mxu1 %v5897_v48 }
 0x6c9   : >> { %4704 = vmatprep.subr.bf16.mxu1 %v5598_v5 }
 0x6cc   : >> { %4706 = vmatpush3.bf16.msra.mxu1 %v5900_v51 }
 0x6cd   : >> { %4731 = vmatprep.subr.bf16.mxu1 %v5598_v5 }
 0x782   : >> { %v912_v43 = vpop.f32.mrb[6].mxu1 }
 0x783   : >> { %v913_v44 = vadd.f32 %v5937_v57, %v912_v43  ;;  %v3626_v46 = vpop.f32.mrb[7].mxu1 }
 0x785   : >> { %v923_v49 = vadd.f32 %v922_v34, %v913_v44 }
 0x787   : >> { %v925_v50 = vmul.f32 %v6070_v47, %v923_v49 }
 0x789   : >> { %v6074_v53 = vadd.f32 %v5586_v1, %v925_v50 }
 0x78b   : >> { %3660 = vmatmul.mubr.f32.vlgmr.msra.gmra.mrb[8].mxu0 %v6074_v53 }
 0x78c   : >> { %4709 = vmatpush3.bf16.msra.mxu0 %v5817_v6  ;;  %3729 = vmatprep.mubr.msk.f32.mxu0 %vm5599_vm0, %v5600_v8 }
 0x78d   : >> { %4710 = vmatprep.subr.bf16.mxu0 %v5598_v5 }
 0x790   : >> { %4712 = vmatpush3.bf16.msra.mxu0 %v5825_v9 }
 0x791   : >> { %4713 = vmatprep.subr.bf16.mxu0 %v5598_v5 }
 0x794   : >> { %4715 = vmatpush3.bf16.msra.mxu0 %v5831_v17 }
 0x795   : >> { %4716 = vmatprep.subr.bf16.mxu0 %v5598_v5 }
 0x798   : >> { %4718 = vmatpush3.bf16.msra.mxu0 %v5839_v23 }
 0x799   : >> { %4719 = vmatprep.subr.bf16.mxu0 %v5598_v5 }
 0x79c   : >> { %4721 = vmatpush3.bf16.msra.mxu0 %v5847_v29 }
 0x79d   : >> { %4722 = vmatprep.subr.bf16.mxu0 %v5598_v5 }
 0x7a0   : >> { %4724 = vmatpush3.bf16.msra.mxu0 %v5855_v35 }
 0x7a1   : >> { %4725 = vmatprep.subr.bf16.mxu0 %v5598_v5 }
 0x7a4   : >> { %4727 = vmatpush3.bf16.msra.mxu0 %v5863_v39 }
 0x7a5   : >> { %4728 = vmatprep.subr.bf16.mxu0 %v5598_v5 }
 0x7a8   : >> { %4730 = vmatpush3.bf16.msra.mxu0 %v5869_v42 }
 0x7a9   : >> { %4755 = vmatprep.subr.bf16.mxu0 %v5598_v5 }
 0x85e   : >> { %v993_v1 = vpop.f32.mrb[8].mxu0 }
 0x85f   : >> { %v994_v54 = vadd.f32 %v5908_v52, %v993_v1  ;;  %v3661_v55 = vpop.f32.mrb[9].mxu0 }
 0x861   : >> { %5361 = vtanh.f32 %v994_v54 }
 0x86b   : >> { %v5362_v56 = vpop.eup %5361 }
 0x86c   : >> { %3695 = vmatmul.mubr.f32.vlgmr.msra.gmra.mrb[8].mxu1 %v5362_v56 }
 0x86d   : >> { %4733 = vmatpush3.bf16.msra.mxu1 %v5828_v14  ;;  %3764 = vmatprep.mubr.msk.f32.mxu1 %vm5599_vm0, %v5600_v8 }
 0x86e   : >> { %4734 = vmatprep.subr.bf16.mxu1 %v5598_v5 }
 0x871   : >> { %4736 = vmatpush3.bf16.msra.mxu1 %v5835_v20 }
 0x872   : >> { %4737 = vmatprep.subr.bf16.mxu1 %v5598_v5 }
 0x875   : >> { %4739 = vmatpush3.bf16.msra.mxu1 %v5843_v26 }
 0x876   : >> { %4740 = vmatprep.subr.bf16.mxu1 %v5598_v5 }
 0x879   : >> { %4742 = vmatpush3.bf16.msra.mxu1 %v5851_v32 }
 0x87a   : >> { %4743 = vmatprep.subr.bf16.mxu1 %v5598_v5 }
 0x87d   : >> { %4745 = vmatpush3.bf16.msra.mxu1 %v5859_v38 }
 0x87e   : >> { %4746 = vmatprep.subr.bf16.mxu1 %v5598_v5 }
 0x881   : >> { %4748 = vmatpush3.bf16.msra.mxu1 %v5893_v45 }
 0x882   : >> { %4749 = vmatprep.subr.bf16.mxu1 %v5598_v5 }
 0x885   : >> { %4751 = vmatpush3.bf16.msra.mxu1 %v5897_v48 }
 0x886   : >> { %4752 = vmatprep.subr.bf16.mxu1 %v5598_v5 }
 0x889   : >> { %4754 = vmatpush3.bf16.msra.mxu1 %v5900_v51 }
 0x88a   : >> { %4779 = vmatprep.subr.bf16.mxu1 %v5598_v5 }
 0x93f   : >> { %v1064_v58 = vpop.f32.mrb[8].mxu1 }
 0x940   : >> { %v6115_v60 = vadd.f32 %v5937_v57, %v1064_v58  ;;  %v3696_v61 = vpop.f32.mrb[9].mxu1 }
 0x942   : >> { %v1068_v62 = vmul.f32 %v6115_v60, %v5939_v59 }
 0x944   : >> { %v1069_v63 = vadd.f32 %v1068_v62, %v6074_v53 }
 0x946   : >> { %3730 = vmatmul.mubr.f32.vlgmr.msra.gmra.mrb[10].mxu0 %v1069_v63 }
 0x947   : >> { %4757 = vmatpush3.bf16.msra.mxu0 %v5817_v6  ;;  %3799 = vmatprep.mubr.msk.f32.mxu0 %vm5599_vm0, %v5600_v8 }
 0x948   : >> { %4758 = vmatprep.subr.bf16.mxu0 %v5598_v5 }
 0x94b   : >> { %4760 = vmatpush3.bf16.msra.mxu0 %v5825_v9 }
 0x94c   : >> { %4761 = vmatprep.subr.bf16.mxu0 %v5598_v5 }
 0x94f   : >> { %4763 = vmatpush3.bf16.msra.mxu0 %v5831_v17 }
 0x950   : >> { %4764 = vmatprep.subr.bf16.mxu0 %v5598_v5 }
 0x953   : >> { %4766 = vmatpush3.bf16.msra.mxu0 %v5839_v23 }
 0x954   : >> { %4767 = vmatprep.subr.bf16.mxu0 %v5598_v5 }
 0x957   : >> { %4769 = vmatpush3.bf16.msra.mxu0 %v5847_v29 }
 0x958   : >> { %4770 = vmatprep.subr.bf16.mxu0 %v5598_v5 }
 0x95b   : >> { %4772 = vmatpush3.bf16.msra.mxu0 %v5855_v35 }
 0x95c   : >> { %4773 = vmatprep.subr.bf16.mxu0 %v5598_v5 }
 0x95f   : >> { %4775 = vmatpush3.bf16.msra.mxu0 %v5863_v39 }
 0x960   : >> { %4776 = vmatprep.subr.bf16.mxu0 %v5598_v5 }
 0x963   : >> { %4778 = vmatpush3.bf16.msra.mxu0 %v5869_v42 }
 0x964   : >> { %4803 = vmatprep.subr.bf16.mxu0 %v5598_v5 }
 0xa19   : >> { %v1136_v0 = vpop.f32.mrb[10].mxu0 }
 0xa1a   : >> { %v1137_v2 = vadd.f32 %v5908_v52, %v1136_v0  ;;  %v3731_v3 = vpop.f32.mrb[11].mxu0 }
 0xa1c   : >> { %5363 = vtanh.f32 %v1137_v2 }
 0xa26   : >> { %v5364_v4 = vpop.eup %5363 }
 0xa27   : >> { %3765 = vmatmul.mubr.f32.vlgmr.msra.gmra.mrb[10].mxu1 %v5364_v4 }
 0xa28   : >> { %4781 = vmatpush3.bf16.msra.mxu1 %v5828_v14  ;;  %3834 = vmatprep.mubr.msk.f32.mxu1 %vm5599_vm0, %v5600_v8 }
 0xa29   : >> { %4782 = vmatprep.subr.bf16.mxu1 %v5598_v5 }
 0xa2c   : >> { %4784 = vmatpush3.bf16.msra.mxu1 %v5835_v20 }
 0xa2d   : >> { %4785 = vmatprep.subr.bf16.mxu1 %v5598_v5 }
 0xa30   : >> { %4787 = vmatpush3.bf16.msra.mxu1 %v5843_v26 }
 0xa31   : >> { %4788 = vmatprep.subr.bf16.mxu1 %v5598_v5 }
 0xa34   : >> { %4790 = vmatpush3.bf16.msra.mxu1 %v5851_v32 }
 0xa35   : >> { %4791 = vmatprep.subr.bf16.mxu1 %v5598_v5 }
 0xa38   : >> { %4793 = vmatpush3.bf16.msra.mxu1 %v5859_v38 }
 0xa39   : >> { %4794 = vmatprep.subr.bf16.mxu1 %v5598_v5 }
 0xa3c   : >> { %4796 = vmatpush3.bf16.msra.mxu1 %v5893_v45 }
 0xa3d   : >> { %4797 = vmatprep.subr.bf16.mxu1 %v5598_v5 }
 0xa40   : >> { %4799 = vmatpush3.bf16.msra.mxu1 %v5897_v48 }
 0xa41   : >> { %4800 = vmatprep.subr.bf16.mxu1 %v5598_v5 }
 0xa44   : >> { %4802 = vmatpush3.bf16.msra.mxu1 %v5900_v51 }
 0xa45   : >> { %4827 = vmatprep.subr.bf16.mxu1 %v5598_v5 }
 0xafa   : >> { %v1207_v7 = vpop.f32.mrb[10].mxu1 }
 0xafb   : >> { %v1208_v10 = vadd.f32 %v5937_v57, %v1207_v7  ;;  %v3766_v11 = vpop.f32.mrb[11].mxu1 }
 0xafd   : >> { %v1211_v12 = vmul.f32 %v1208_v10, %v5939_v59  ;;  %v1497_v21 = vmul.f32 2.0, %v1208_v10 }
 0xaff   : >> { %v1212_v13 = vadd.f32 %v1211_v12, %v6074_v53  ;;  %v1498_v28 = vadd.f32 %v1497_v21, %v6115_v60 }
 0xb01   : >> { %3800 = vmatmul.mubr.f32.vlgmr.msra.gmra.mrb[12].mxu0 %v1212_v13 }
 0xb02   : >> { %4805 = vmatpush3.bf16.msra.mxu0 %v5817_v6  ;;  %3869 = vmatprep.mubr.msk.f32.mxu0 %vm5599_vm0, %v5600_v8 }
 0xb03   : >> { %4806 = vmatprep.subr.bf16.mxu0 %v5598_v5 }
 0xb06   : >> { %4808 = vmatpush3.bf16.msra.mxu0 %v5825_v9 }
 0xb07   : >> { %4809 = vmatprep.subr.bf16.mxu0 %v5598_v5 }
 0xb0a   : >> { %4811 = vmatpush3.bf16.msra.mxu0 %v5831_v17 }
 0xb0b   : >> { %4812 = vmatprep.subr.bf16.mxu0 %v5598_v5 }
 0xb0e   : >> { %4814 = vmatpush3.bf16.msra.mxu0 %v5839_v23 }
 0xb0f   : >> { %4815 = vmatprep.subr.bf16.mxu0 %v5598_v5 }
 0xb12   : >> { %4817 = vmatpush3.bf16.msra.mxu0 %v5847_v29 }
 0xb13   : >> { %4818 = vmatprep.subr.bf16.mxu0 %v5598_v5 }
 0xb16   : >> { %4820 = vmatpush3.bf16.msra.mxu0 %v5855_v35 }
 0xb17   : >> { %4821 = vmatprep.subr.bf16.mxu0 %v5598_v5 }
 0xb1a   : >> { %4823 = vmatpush3.bf16.msra.mxu0 %v5863_v39 }
 0xb1b   : >> { %4824 = vmatprep.subr.bf16.mxu0 %v5598_v5 }
 0xb1e   : >> { %4826 = vmatpush3.bf16.msra.mxu0 %v5869_v42 }
 0xb1f   : >> { %4851 = vmatprep.subr.bf16.mxu0 %v5598_v5 }
 0xbd4   : >> { %v1279_v15 = vpop.f32.mrb[12].mxu0 }
 0xbd5   : >> { %v1280_v16 = vadd.f32 %v5908_v52, %v1279_v15  ;;  %v3801_v18 = vpop.f32.mrb[13].mxu0 }
 0xbd7   : >> { %5365 = vtanh.f32 %v1280_v16 }
 0xbe1   : >> { %v5366_v19 = vpop.eup %5365 }
 0xbe2   : >> { %3835 = vmatmul.mubr.f32.vlgmr.msra.gmra.mrb[12].mxu1 %v5366_v19 }
 0xbe3   : >> { %4829 = vmatpush3.bf16.msra.mxu1 %v5828_v14  ;;  %3904 = vmatprep.mubr.msk.f32.mxu1 %vm5599_vm0, %v5600_v8 }
 0xbe4   : >> { %4830 = vmatprep.subr.bf16.mxu1 %v5598_v5 }
 0xbe7   : >> { %4832 = vmatpush3.bf16.msra.mxu1 %v5835_v20 }
 0xbe8   : >> { %4833 = vmatprep.subr.bf16.mxu1 %v5598_v5 }
 0xbeb   : >> { %4835 = vmatpush3.bf16.msra.mxu1 %v5843_v26 }
 0xbec   : >> { %4836 = vmatprep.subr.bf16.mxu1 %v5598_v5 }
 0xbef   : >> { %4838 = vmatpush3.bf16.msra.mxu1 %v5851_v32 }
 0xbf0   : >> { %4839 = vmatprep.subr.bf16.mxu1 %v5598_v5 }
 0xbf3   : >> { %4841 = vmatpush3.bf16.msra.mxu1 %v5859_v38 }
 0xbf4   : >> { %4842 = vmatprep.subr.bf16.mxu1 %v5598_v5 }
 0xbf7   : >> { %4844 = vmatpush3.bf16.msra.mxu1 %v5893_v45 }
 0xbf8   : >> { %4845 = vmatprep.subr.bf16.mxu1 %v5598_v5 }
 0xbfb   : >> { %4847 = vmatpush3.bf16.msra.mxu1 %v5897_v48 }
 0xbfc   : >> { %4848 = vmatprep.subr.bf16.mxu1 %v5598_v5 }
 0xbff   : >> { %4850 = vmatpush3.bf16.msra.mxu1 %v5900_v51 }
 0xc00   : >> { %4875 = vmatprep.subr.bf16.mxu1 %v5598_v5 }
 0xcb5   : >> { %v1350_v22 = vpop.f32.mrb[12].mxu1 }
 0xcb6   : >> { %v1351_v25 = vadd.f32 %v5937_v57, %v1350_v22  ;;  %v3836_v27 = vpop.f32.mrb[13].mxu1 }
 0xcb8   : >> { %v1354_v30 = vmul.f32 %v1351_v25, %v6025_v24  ;;  %v1499_v31 = vmul.f32 2.0, %v1351_v25 }
 0xcba   : >> { %v1355_v33 = vadd.f32 %v1354_v30, %v6074_v53  ;;  %v1500_v34 = vadd.f32 %v1499_v31, %v1498_v28 }
 0xcbc   : >> { %3870 = vmatmul.mubr.f32.vlgmr.msra.gmra.mrb[14].mxu0 %v1355_v33 }
 0xcbd   : >> { %4853 = vmatpush3.bf16.msra.mxu0 %v5817_v6  ;;  %3939 = vmatprep.mubr.msk.f32.mxu0 %vm5599_vm0, %v5600_v8 }
 0xcbe   : >> { %4854 = vmatprep.subr.bf16.mxu0 %v5598_v5 }
 0xcc1   : >> { %4856 = vmatpush3.bf16.msra.mxu0 %v5825_v9 }
 0xcc2   : >> { %4857 = vmatprep.subr.bf16.mxu0 %v5598_v5 }
 0xcc5   : >> { %4859 = vmatpush3.bf16.msra.mxu0 %v5831_v17 }
 0xcc6   : >> { %4860 = vmatprep.subr.bf16.mxu0 %v5598_v5 }
 0xcc9   : >> { %4862 = vmatpush3.bf16.msra.mxu0 %v5839_v23 }
 0xcca   : >> { %4863 = vmatprep.subr.bf16.mxu0 %v5598_v5 }
 0xccd   : >> { %4865 = vmatpush3.bf16.msra.mxu0 %v5847_v29 }
 0xcce   : >> { %4866 = vmatprep.subr.bf16.mxu0 %v5598_v5 }
 0xcd1   : >> { %4868 = vmatpush3.bf16.msra.mxu0 %v5855_v35 }
 0xcd2   : >> { %4869 = vmatprep.subr.bf16.mxu0 %v5598_v5 }
 0xcd5   : >> { %4871 = vmatpush3.bf16.msra.mxu0 %v5863_v39 }
 0xcd6   : >> { %4872 = vmatprep.subr.bf16.mxu0 %v5598_v5 }
 0xcd9   : >> { %4874 = vmatpush3.bf16.msra.mxu0 %v5869_v42 }
 0xcda   : >> { %4899 = vmatprep.subr.bf16.mxu0 %v5598_v5 }
 0xd8f   : >> { %v1422_v36 = vpop.f32.mrb[14].mxu0 }
 0xd90   : >> { %v1423_v37 = vadd.f32 %v5908_v52, %v1422_v36  ;;  %v3871_v40 = vpop.f32.mrb[15].mxu0 }
 0xd92   : >> { %5367 = vtanh.f32 %v1423_v37 }
 0xd9c   : >> { %v5368_v41 = vpop.eup %5367 }
 0xd9d   : >> { %3905 = vmatmul.mubr.f32.vlgmr.msra.gmra.mrb[14].mxu1 %v5368_v41 }
 0xd9e   : >> { %4877 = vmatpush3.bf16.msra.mxu1 %v5828_v14  ;;  %3974 = vmatprep.mubr.msk.f32.mxu1 %vm5599_vm0, %v5600_v8 }
 0xd9f   : >> { %4878 = vmatprep.subr.bf16.mxu1 %v5598_v5 }
 0xda2   : >> { %4880 = vmatpush3.bf16.msra.mxu1 %v5835_v20 }
 0xda3   : >> { %4881 = vmatprep.subr.bf16.mxu1 %v5598_v5 }
 0xda6   : >> { %4883 = vmatpush3.bf16.msra.mxu1 %v5843_v26 }
 0xda7   : >> { %4884 = vmatprep.subr.bf16.mxu1 %v5598_v5 }
 0xdaa   : >> { %4886 = vmatpush3.bf16.msra.mxu1 %v5851_v32 }
 0xdab   : >> { %4887 = vmatprep.subr.bf16.mxu1 %v5598_v5 }
 0xdae   : >> { %4889 = vmatpush3.bf16.msra.mxu1 %v5859_v38 }
 0xdaf   : >> { %4890 = vmatprep.subr.bf16.mxu1 %v5598_v5 }
 0xdb2   : >> { %4892 = vmatpush3.bf16.msra.mxu1 %v5893_v45 }
 0xdb3   : >> { %4893 = vmatprep.subr.bf16.mxu1 %v5598_v5 }
 0xdb6   : >> { %4895 = vmatpush3.bf16.msra.mxu1 %v5897_v48 }
 0xdb7   : >> { %4896 = vmatprep.subr.bf16.mxu1 %v5598_v5 }
 0xdba   : >> { %4898 = vmatpush3.bf16.msra.mxu1 %v5900_v51 }
 0xdbb   : >> { %4923 = vmatprep.subr.bf16.mxu1 %v5598_v5 }
 0xe70   : >> { %v1493_v43 = vpop.f32.mrb[14].mxu1 }
 0xe71   : >> { %v1494_v44 = vadd.f32 %v5937_v57, %v1493_v43  ;;  %v3906_v46 = vpop.f32.mrb[15].mxu1  ;;  %v6413_v43 = vld [vmem:[%s6616_s5] ss:$0 sm:$0xff] }
 0xe73   : >> { %v1501_v49 = vadd.f32 %v1500_v34, %v1494_v44  ;;  %v6389_v34 = vld [vmem:[%s6614_s3] ss:$0 sm:$0xff] }
 0xe75   : >> { %v1502_v50 = vmul.f32 %v1501_v49, %v6070_v47 }
 0xe77   : >> { %v6241_v1 = vadd.f32 %v1502_v50, %v6074_v53 }
 0xe79   : >> { %3940 = vmatmul.mubr.f32.vlgmr.msra.gmra.mrb[16].mxu0 %v6241_v1 }
 0xe7a   : >> { %4901 = vmatpush3.bf16.msra.mxu0 %v5817_v6  ;;  %4009 = vmatprep.mubr.msk.f32.mxu0 %vm5599_vm0, %v5600_v8 }
 0xe7b   : >> { %4902 = vmatprep.subr.bf16.mxu0 %v5598_v5 }
 0xe7e   : >> { %4904 = vmatpush3.bf16.msra.mxu0 %v5825_v9 }
 0xe7f   : >> { %4905 = vmatprep.subr.bf16.mxu0 %v5598_v5 }
 0xe82   : >> { %4907 = vmatpush3.bf16.msra.mxu0 %v5831_v17 }
 0xe83   : >> { %4908 = vmatprep.subr.bf16.mxu0 %v5598_v5 }
 0xe86   : >> { %4910 = vmatpush3.bf16.msra.mxu0 %v5839_v23 }
 0xe87   : >> { %4911 = vmatprep.subr.bf16.mxu0 %v5598_v5 }
 0xe8a   : >> { %4913 = vmatpush3.bf16.msra.mxu0 %v5847_v29 }
 0xe8b   : >> { %4914 = vmatprep.subr.bf16.mxu0 %v5598_v5 }
 0xe8e   : >> { %4916 = vmatpush3.bf16.msra.mxu0 %v5855_v35 }
 0xe8f   : >> { %4917 = vmatprep.subr.bf16.mxu0 %v5598_v5 }
 0xe92   : >> { %4919 = vmatpush3.bf16.msra.mxu0 %v5863_v39 }
 0xe93   : >> { %4920 = vmatprep.subr.bf16.mxu0 %v5598_v5 }
 0xe96   : >> { %4922 = vmatpush3.bf16.msra.mxu0 %v5869_v42 }
 0xe97   : >> { %4947 = vmatprep.subr.bf16.mxu0 %v5598_v5 }
 0xf4c   : >> { %v1570_v53 = vpop.f32.mrb[16].mxu0 }
 0xf4d   : >> { %v1571_v54 = vadd.f32 %v5908_v52, %v1570_v53  ;;  %v3941_v55 = vpop.f32.mrb[17].mxu0 }
 0xf4f   : >> { %5369 = vtanh.f32 %v1571_v54 }
 0xf59   : >> { %v5370_v56 = vpop.eup %5369 }
 0xf5a   : >> { %3975 = vmatmul.mubr.f32.vlgmr.msra.gmra.mrb[16].mxu1 %v5370_v56 }
 0xf5b   : >> { %4925 = vmatpush3.bf16.msra.mxu1 %v5828_v14  ;;  %4044 = vmatprep.mubr.msk.f32.mxu1 %vm5599_vm0, %v5600_v8 }
 0xf5c   : >> { %4926 = vmatprep.subr.bf16.mxu1 %v5598_v5 }
 0xf5f   : >> { %4928 = vmatpush3.bf16.msra.mxu1 %v5835_v20 }
 0xf60   : >> { %4929 = vmatprep.subr.bf16.mxu1 %v5598_v5 }
 0xf63   : >> { %4931 = vmatpush3.bf16.msra.mxu1 %v5843_v26 }
 0xf64   : >> { %4932 = vmatprep.subr.bf16.mxu1 %v5598_v5 }
 0xf67   : >> { %4934 = vmatpush3.bf16.msra.mxu1 %v5851_v32 }
 0xf68   : >> { %4935 = vmatprep.subr.bf16.mxu1 %v5598_v5 }
 0xf6b   : >> { %4937 = vmatpush3.bf16.msra.mxu1 %v5859_v38 }
 0xf6c   : >> { %4938 = vmatprep.subr.bf16.mxu1 %v5598_v5 }
 0xf6f   : >> { %4940 = vmatpush3.bf16.msra.mxu1 %v5893_v45 }
 0xf70   : >> { %4941 = vmatprep.subr.bf16.mxu1 %v5598_v5 }
 0xf73   : >> { %4943 = vmatpush3.bf16.msra.mxu1 %v5897_v48 }
 0xf74   : >> { %4944 = vmatprep.subr.bf16.mxu1 %v5598_v5 }
 0xf77   : >> { %4946 = vmatpush3.bf16.msra.mxu1 %v5900_v51 }
 0xf78   : >> { %4971 = vmatprep.subr.bf16.mxu1 %v5598_v5 }
0x102d   : >> { %v1641_v58 = vpop.f32.mrb[16].mxu1 }
0x102e   : >> { %v6282_v60 = vadd.f32 %v5937_v57, %v1641_v58  ;;  %v3976_v61 = vpop.f32.mrb[17].mxu1 }
0x1030   : >> { %v1645_v62 = vmul.f32 %v6282_v60, %v5939_v59 }
0x1032   : >> { %v1646_v63 = vadd.f32 %v1645_v62, %v6241_v1 }
0x1034   : >> { %4010 = vmatmul.mubr.f32.vlgmr.msra.gmra.mrb[18].mxu0 %v1646_v63 }
0x1035   : >> { %4949 = vmatpush3.bf16.msra.mxu0 %v5817_v6  ;;  %4079 = vmatprep.mubr.msk.f32.mxu0 %vm5599_vm0, %v5600_v8 }
0x1036   : >> { %4950 = vmatprep.subr.bf16.mxu0 %v5598_v5 }
0x1039   : >> { %4952 = vmatpush3.bf16.msra.mxu0 %v5825_v9 }
0x103a   : >> { %4953 = vmatprep.subr.bf16.mxu0 %v5598_v5 }
0x103d   : >> { %4955 = vmatpush3.bf16.msra.mxu0 %v5831_v17 }
0x103e   : >> { %4956 = vmatprep.subr.bf16.mxu0 %v5598_v5 }
0x1041   : >> { %4958 = vmatpush3.bf16.msra.mxu0 %v5839_v23 }
0x1042   : >> { %4959 = vmatprep.subr.bf16.mxu0 %v5598_v5 }
0x1045   : >> { %4961 = vmatpush3.bf16.msra.mxu0 %v5847_v29 }
0x1046   : >> { %4962 = vmatprep.subr.bf16.mxu0 %v5598_v5 }
0x1049   : >> { %4964 = vmatpush3.bf16.msra.mxu0 %v5855_v35 }
0x104a   : >> { %4965 = vmatprep.subr.bf16.mxu0 %v5598_v5 }
0x104d   : >> { %4967 = vmatpush3.bf16.msra.mxu0 %v5863_v39 }
0x104e   : >> { %4968 = vmatprep.subr.bf16.mxu0 %v5598_v5 }
0x1051   : >> { %4970 = vmatpush3.bf16.msra.mxu0 %v5869_v42 }
0x1052   : >> { %4995 = vmatprep.subr.bf16.mxu0 %v5598_v5 }
0x1107   : >> { %v1713_v0 = vpop.f32.mrb[18].mxu0 }
0x1108   : >> { %v1714_v2 = vadd.f32 %v5908_v52, %v1713_v0  ;;  %v4011_v3 = vpop.f32.mrb[19].mxu0 }
0x110a   : >> { %5371 = vtanh.f32 %v1714_v2 }
0x1114   : >> { %v5372_v4 = vpop.eup %5371 }
0x1115   : >> { %4045 = vmatmul.mubr.f32.vlgmr.msra.gmra.mrb[18].mxu1 %v5372_v4 }
0x1116   : >> { %4973 = vmatpush3.bf16.msra.mxu1 %v5828_v14  ;;  %4114 = vmatprep.mubr.msk.f32.mxu1 %vm5599_vm0, %v5600_v8 }
0x1117   : >> { %4974 = vmatprep.subr.bf16.mxu1 %v5598_v5 }
0x111a   : >> { %4976 = vmatpush3.bf16.msra.mxu1 %v5835_v20 }
0x111b   : >> { %4977 = vmatprep.subr.bf16.mxu1 %v5598_v5 }
0x111e   : >> { %4979 = vmatpush3.bf16.msra.mxu1 %v5843_v26 }
0x111f   : >> { %4980 = vmatprep.subr.bf16.mxu1 %v5598_v5 }
0x1122   : >> { %4982 = vmatpush3.bf16.msra.mxu1 %v5851_v32 }
0x1123   : >> { %4983 = vmatprep.subr.bf16.mxu1 %v5598_v5 }
0x1126   : >> { %4985 = vmatpush3.bf16.msra.mxu1 %v5859_v38 }
0x1127   : >> { %4986 = vmatprep.subr.bf16.mxu1 %v5598_v5 }
0x112a   : >> { %4988 = vmatpush3.bf16.msra.mxu1 %v5893_v45 }
0x112b   : >> { %4989 = vmatprep.subr.bf16.mxu1 %v5598_v5 }
0x112e   : >> { %4991 = vmatpush3.bf16.msra.mxu1 %v5897_v48 }
0x112f   : >> { %4992 = vmatprep.subr.bf16.mxu1 %v5598_v5 }
0x1132   : >> { %4994 = vmatpush3.bf16.msra.mxu1 %v5900_v51 }
0x1133   : >> { %5019 = vmatprep.subr.bf16.mxu1 %v5598_v5 }
0x11e8   : >> { %v1784_v7 = vpop.f32.mrb[18].mxu1 }
0x11e9   : >> { %v1785_v10 = vadd.f32 %v5937_v57, %v1784_v7  ;;  %v4046_v11 = vpop.f32.mrb[19].mxu1 }
0x11eb   : >> { %v1788_v12 = vmul.f32 %v1785_v10, %v5939_v59 }
0x11ed   : >> { %v1789_v13 = vadd.f32 %v1788_v12, %v6241_v1 }
0x11ef   : >> { %4080 = vmatmul.mubr.f32.vlgmr.msra.gmra.mrb[20].mxu0 %v1789_v13 }
0x11f0   : >> { %4997 = vmatpush3.bf16.msra.mxu0 %v5817_v6  ;;  %4149 = vmatprep.mubr.msk.f32.mxu0 %vm5599_vm0, %v5600_v8 }
0x11f1   : >> { %4998 = vmatprep.subr.bf16.mxu0 %v5598_v5 }
0x11f4   : >> { %5000 = vmatpush3.bf16.msra.mxu0 %v5825_v9 }
0x11f5   : >> { %5001 = vmatprep.subr.bf16.mxu0 %v5598_v5 }
0x11f8   : >> { %5003 = vmatpush3.bf16.msra.mxu0 %v5831_v17 }
0x11f9   : >> { %5004 = vmatprep.subr.bf16.mxu0 %v5598_v5 }
0x11fc   : >> { %5006 = vmatpush3.bf16.msra.mxu0 %v5839_v23 }
0x11fd   : >> { %5007 = vmatprep.subr.bf16.mxu0 %v5598_v5 }
0x1200   : >> { %5009 = vmatpush3.bf16.msra.mxu0 %v5847_v29 }
0x1201   : >> { %5010 = vmatprep.subr.bf16.mxu0 %v5598_v5 }
0x1204   : >> { %5012 = vmatpush3.bf16.msra.mxu0 %v5855_v35 }
0x1205   : >> { %5013 = vmatprep.subr.bf16.mxu0 %v5598_v5 }
0x1208   : >> { %5015 = vmatpush3.bf16.msra.mxu0 %v5863_v39 }
0x1209   : >> { %5016 = vmatprep.subr.bf16.mxu0 %v5598_v5 }
0x120c   : >> { %5018 = vmatpush3.bf16.msra.mxu0 %v5869_v42 }
0x120d   : >> { %5043 = vmatprep.subr.bf16.mxu0 %v5598_v5 }
0x12c2   : >> { %v1856_v15 = vpop.f32.mrb[20].mxu0 }
0x12c3   : >> { %v1857_v16 = vadd.f32 %v5908_v52, %v1856_v15  ;;  %v4081_v18 = vpop.f32.mrb[21].mxu0  ;;  %v2074_v52 = vmul.f32 2.0, %v1785_v10 }
0x12c5   : >> { %5373 = vtanh.f32 %v1857_v16  ;;  %v2075_v27 = vadd.f32 %v2074_v52, %v6282_v60 }
0x12cf   : >> { %v5374_v19 = vpop.eup %5373 }
0x12d0   : >> { %4115 = vmatmul.mubr.f32.vlgmr.msra.gmra.mrb[20].mxu1 %v5374_v19 }
0x12d1   : >> { %5021 = vmatpush3.bf16.msra.mxu1 %v5828_v14  ;;  %4184 = vmatprep.mubr.msk.f32.mxu1 %vm5599_vm0, %v5600_v8 }
0x12d2   : >> { %5022 = vmatprep.subr.bf16.mxu1 %v5598_v5 }
0x12d5   : >> { %5024 = vmatpush3.bf16.msra.mxu1 %v5835_v20 }
0x12d6   : >> { %5025 = vmatprep.subr.bf16.mxu1 %v5598_v5 }
0x12d9   : >> { %5027 = vmatpush3.bf16.msra.mxu1 %v5843_v26 }
0x12da   : >> { %5028 = vmatprep.subr.bf16.mxu1 %v5598_v5 }
0x12dd   : >> { %5030 = vmatpush3.bf16.msra.mxu1 %v5851_v32 }
0x12de   : >> { %5031 = vmatprep.subr.bf16.mxu1 %v5598_v5 }
0x12e1   : >> { %5033 = vmatpush3.bf16.msra.mxu1 %v5859_v38 }
0x12e2   : >> { %5034 = vmatprep.subr.bf16.mxu1 %v5598_v5 }
0x12e5   : >> { %5036 = vmatpush3.bf16.msra.mxu1 %v5893_v45 }
0x12e6   : >> { %5037 = vmatprep.subr.bf16.mxu1 %v5598_v5 }
0x12e9   : >> { %5039 = vmatpush3.bf16.msra.mxu1 %v5897_v48 }
0x12ea   : >> { %5040 = vmatprep.subr.bf16.mxu1 %v5598_v5 }
0x12ed   : >> { %5042 = vmatpush3.bf16.msra.mxu1 %v5900_v51 }
0x12ee   : >> { %5067 = vmatprep.subr.bf16.mxu1 %v5598_v5 }
0x13a3   : >> { %v1927_v21 = vpop.f32.mrb[20].mxu1 }
0x13a4   : >> { %v1928_v22 = vadd.f32 %v5937_v57, %v1927_v21  ;;  %v4116_v25 = vpop.f32.mrb[21].mxu1 }
0x13a6   : >> { %v1931_v28 = vmul.f32 %v1928_v22, %v6025_v24  ;;  %v2076_v30 = vmul.f32 2.0, %v1928_v22 }
0x13a8   : >> { %v1932_v31 = vadd.f32 %v1931_v28, %v6241_v1  ;;  %v2077_v33 = vadd.f32 %v2076_v30, %v2075_v27 }
0x13aa   : >> { %4150 = vmatmul.mubr.f32.vlgmr.msra.gmra.mrb[22].mxu0 %v1932_v31 }
0x13ab   : >> { %5045 = vmatpush3.bf16.msra.mxu0 %v5817_v6  ;;  %4219 = vmatprep.mubr.msk.f32.mxu0 %vm5599_vm0, %v5600_v8 }
0x13ac   : >> { %5046 = vmatprep.subr.bf16.mxu0 %v5598_v5 }
0x13af   : >> { %5048 = vmatpush3.bf16.msra.mxu0 %v5825_v9 }
0x13b0   : >> { %5049 = vmatprep.subr.bf16.mxu0 %v5598_v5 }
0x13b3   : >> { %5051 = vmatpush3.bf16.msra.mxu0 %v5831_v17 }
0x13b4   : >> { %5052 = vmatprep.subr.bf16.mxu0 %v5598_v5 }
0x13b7   : >> { %5054 = vmatpush3.bf16.msra.mxu0 %v5839_v23 }
0x13b8   : >> { %5055 = vmatprep.subr.bf16.mxu0 %v5598_v5 }
0x13bb   : >> { %5057 = vmatpush3.bf16.msra.mxu0 %v5847_v29 }
0x13bc   : >> { %5058 = vmatprep.subr.bf16.mxu0 %v5598_v5 }
0x13bf   : >> { %5060 = vmatpush3.bf16.msra.mxu0 %v5855_v35 }
0x13c0   : >> { %5061 = vmatprep.subr.bf16.mxu0 %v5598_v5 }
0x13c3   : >> { %5063 = vmatpush3.bf16.msra.mxu0 %v5863_v39 }
0x13c4   : >> { %5064 = vmatprep.subr.bf16.mxu0 %v5598_v5 }
0x13c7   : >> { %5066 = vmatpush3.bf16.msra.mxu0 %v5869_v42 }
0x13c8   : >> { %5091 = vmatprep.subr.bf16.mxu0 %v5598_v5 }
0x147d   : >> { %v1999_v57 = vpop.f32.mrb[22].mxu0 }
0x147e   : >> { %v2000_v36 = vadd.f32 %v6389_v34, %v1999_v57  ;;  %v4151_v37 = vpop.f32.mrb[23].mxu0 }
0x1480   : >> { %5375 = vtanh.f32 %v2000_v36 }
0x148a   : >> { %v5376_v40 = vpop.eup %5375 }
0x148b   : >> { %4185 = vmatmul.mubr.f32.vlgmr.msra.gmra.mrb[22].mxu1 %v5376_v40 }
0x148c   : >> { %5069 = vmatpush3.bf16.msra.mxu1 %v5828_v14  ;;  %4254 = vmatprep.mubr.msk.f32.mxu1 %vm5599_vm0, %v5600_v8 }
0x148d   : >> { %5070 = vmatprep.subr.bf16.mxu1 %v5598_v5 }
0x1490   : >> { %5072 = vmatpush3.bf16.msra.mxu1 %v5835_v20 }
0x1491   : >> { %5073 = vmatprep.subr.bf16.mxu1 %v5598_v5 }
0x1494   : >> { %5075 = vmatpush3.bf16.msra.mxu1 %v5843_v26 }
0x1495   : >> { %5076 = vmatprep.subr.bf16.mxu1 %v5598_v5 }
0x1498   : >> { %5078 = vmatpush3.bf16.msra.mxu1 %v5851_v32 }
0x1499   : >> { %5079 = vmatprep.subr.bf16.mxu1 %v5598_v5 }
0x149c   : >> { %5081 = vmatpush3.bf16.msra.mxu1 %v5859_v38 }
0x149d   : >> { %5082 = vmatprep.subr.bf16.mxu1 %v5598_v5 }
0x14a0   : >> { %5084 = vmatpush3.bf16.msra.mxu1 %v5893_v45 }
0x14a1   : >> { %5085 = vmatprep.subr.bf16.mxu1 %v5598_v5 }
0x14a4   : >> { %5087 = vmatpush3.bf16.msra.mxu1 %v5897_v48 }
0x14a5   : >> { %5088 = vmatprep.subr.bf16.mxu1 %v5598_v5 }
0x14a8   : >> { %5090 = vmatpush3.bf16.msra.mxu1 %v5900_v51 }
0x14a9   : >> { %5115 = vmatprep.subr.bf16.mxu1 %v5598_v5 }
0x155e   : >> { %v2070_v41 = vpop.f32.mrb[22].mxu1 }
0x155f   : >> { %v2071_v44 = vadd.f32 %v6413_v43, %v2070_v41  ;;  %v4186_v46 = vpop.f32.mrb[23].mxu1 }
0x1561   : >> { %v2078_v49 = vadd.f32 %v2077_v33, %v2071_v44 }
0x1563   : >> { %v2079_v50 = vmul.f32 %v2078_v49, %v6070_v47 }
0x1565   : >> { %v6418_v53 = vadd.f32 %v2079_v50, %v6241_v1 }
0x1567   : >> { %4220 = vmatmul.mubr.f32.vlgmr.msra.gmra.mrb[24].mxu0 %v6418_v53 }
0x1568   : >> { %5093 = vmatpush3.bf16.msra.mxu0 %v5817_v6  ;;  %4289 = vmatprep.mubr.msk.f32.mxu0 %vm5599_vm0, %v5600_v8 }
0x1569   : >> { %5094 = vmatprep.subr.bf16.mxu0 %v5598_v5 }
0x156c   : >> { %5096 = vmatpush3.bf16.msra.mxu0 %v5825_v9 }
0x156d   : >> { %5097 = vmatprep.subr.bf16.mxu0 %v5598_v5 }
0x1570   : >> { %5099 = vmatpush3.bf16.msra.mxu0 %v5831_v17 }
0x1571   : >> { %5100 = vmatprep.subr.bf16.mxu0 %v5598_v5 }
0x1574   : >> { %5102 = vmatpush3.bf16.msra.mxu0 %v5839_v23 }
0x1575   : >> { %5103 = vmatprep.subr.bf16.mxu0 %v5598_v5 }
0x1578   : >> { %5105 = vmatpush3.bf16.msra.mxu0 %v5847_v29 }
0x1579   : >> { %5106 = vmatprep.subr.bf16.mxu0 %v5598_v5 }
0x157c   : >> { %5108 = vmatpush3.bf16.msra.mxu0 %v5855_v35 }
0x157d   : >> { %5109 = vmatprep.subr.bf16.mxu0 %v5598_v5 }
0x1580   : >> { %5111 = vmatpush3.bf16.msra.mxu0 %v5863_v39 }
0x1581   : >> { %5112 = vmatprep.subr.bf16.mxu0 %v5598_v5 }
0x1584   : >> { %5114 = vmatpush3.bf16.msra.mxu0 %v5869_v42 }
0x1585   : >> { %5139 = vmatprep.subr.bf16.mxu0 %v5598_v5 }
0x163a   : >> { %v2147_v1 = vpop.f32.mrb[24].mxu0 }
0x163b   : >> { %v2148_v54 = vadd.f32 %v6389_v34, %v2147_v1  ;;  %v4221_v55 = vpop.f32.mrb[25].mxu0 }
0x163d   : >> { %5377 = vtanh.f32 %v2148_v54 }
0x1647   : >> { %v5378_v56 = vpop.eup %5377 }
0x1648   : >> { %4255 = vmatmul.mubr.f32.vlgmr.msra.gmra.mrb[24].mxu1 %v5378_v56 }
0x1649   : >> { %5117 = vmatpush3.bf16.msra.mxu1 %v5828_v14  ;;  %4324 = vmatprep.mubr.msk.f32.mxu1 %vm5599_vm0, %v5600_v8 }
0x164a   : >> { %5118 = vmatprep.subr.bf16.mxu1 %v5598_v5 }
0x164d   : >> { %5120 = vmatpush3.bf16.msra.mxu1 %v5835_v20 }
0x164e   : >> { %5121 = vmatprep.subr.bf16.mxu1 %v5598_v5 }
0x1651   : >> { %5123 = vmatpush3.bf16.msra.mxu1 %v5843_v26 }
0x1652   : >> { %5124 = vmatprep.subr.bf16.mxu1 %v5598_v5 }
0x1655   : >> { %5126 = vmatpush3.bf16.msra.mxu1 %v5851_v32 }
0x1656   : >> { %5127 = vmatprep.subr.bf16.mxu1 %v5598_v5 }
0x1659   : >> { %5129 = vmatpush3.bf16.msra.mxu1 %v5859_v38 }
0x165a   : >> { %5130 = vmatprep.subr.bf16.mxu1 %v5598_v5 }
0x165d   : >> { %5132 = vmatpush3.bf16.msra.mxu1 %v5893_v45 }
0x165e   : >> { %5133 = vmatprep.subr.bf16.mxu1 %v5598_v5 }
0x1661   : >> { %5135 = vmatpush3.bf16.msra.mxu1 %v5897_v48 }
0x1662   : >> { %5136 = vmatprep.subr.bf16.mxu1 %v5598_v5 }
0x1665   : >> { %5138 = vmatpush3.bf16.msra.mxu1 %v5900_v51 }
0x1666   : >> { %5163 = vmatprep.subr.bf16.mxu1 %v5598_v5 }
0x171b   : >> { %v2218_v58 = vpop.f32.mrb[24].mxu1 }
0x171c   : >> { %v6459_v60 = vadd.f32 %v6413_v43, %v2218_v58  ;;  %v4256_v61 = vpop.f32.mrb[25].mxu1 }
0x171e   : >> { %v2222_v62 = vmul.f32 %v6459_v60, %v5939_v59 }
0x1720   : >> { %v2223_v63 = vadd.f32 %v2222_v62, %v6418_v53 }
0x1722   : >> { %4290 = vmatmul.mubr.f32.vlgmr.msra.gmra.mrb[26].mxu0 %v2223_v63 }
0x1723   : >> { %5141 = vmatpush3.bf16.msra.mxu0 %v5817_v6  ;;  %4359 = vmatprep.mubr.msk.f32.mxu0 %vm5599_vm0, %v5600_v8 }
0x1724   : >> { %5142 = vmatprep.subr.bf16.mxu0 %v5598_v5 }
0x1727   : >> { %5144 = vmatpush3.bf16.msra.mxu0 %v5825_v9 }
0x1728   : >> { %5145 = vmatprep.subr.bf16.mxu0 %v5598_v5 }
0x172b   : >> { %5147 = vmatpush3.bf16.msra.mxu0 %v5831_v17 }
0x172c   : >> { %5148 = vmatprep.subr.bf16.mxu0 %v5598_v5 }
0x172f   : >> { %5150 = vmatpush3.bf16.msra.mxu0 %v5839_v23 }
0x1730   : >> { %5151 = vmatprep.subr.bf16.mxu0 %v5598_v5 }
0x1733   : >> { %5153 = vmatpush3.bf16.msra.mxu0 %v5847_v29 }
0x1734   : >> { %5154 = vmatprep.subr.bf16.mxu0 %v5598_v5 }
0x1737   : >> { %5156 = vmatpush3.bf16.msra.mxu0 %v5855_v35 }
0x1738   : >> { %5157 = vmatprep.subr.bf16.mxu0 %v5598_v5 }
0x173b   : >> { %5159 = vmatpush3.bf16.msra.mxu0 %v5863_v39 }
0x173c   : >> { %5160 = vmatprep.subr.bf16.mxu0 %v5598_v5 }
0x173f   : >> { %5162 = vmatpush3.bf16.msra.mxu0 %v5869_v42 }
0x1740   : >> { %5187 = vmatprep.subr.bf16.mxu0 %v5598_v5 }
0x17f5   : >> { %v2290_v0 = vpop.f32.mrb[26].mxu0 }
0x17f6   : >> { %v2291_v2 = vadd.f32 %v6389_v34, %v2290_v0  ;;  %v4291_v3 = vpop.f32.mrb[27].mxu0 }
0x17f8   : >> { %5379 = vtanh.f32 %v2291_v2 }
0x1802   : >> { %v5380_v4 = vpop.eup %5379 }
0x1803   : >> { %4325 = vmatmul.mubr.f32.vlgmr.msra.gmra.mrb[26].mxu1 %v5380_v4 }
0x1804   : >> { %5165 = vmatpush3.bf16.msra.mxu1 %v5828_v14  ;;  %4394 = vmatprep.mubr.msk.f32.mxu1 %vm5599_vm0, %v5600_v8 }
0x1805   : >> { %5166 = vmatprep.subr.bf16.mxu1 %v5598_v5 }
0x1808   : >> { %5168 = vmatpush3.bf16.msra.mxu1 %v5835_v20 }
0x1809   : >> { %5169 = vmatprep.subr.bf16.mxu1 %v5598_v5 }
0x180c   : >> { %5171 = vmatpush3.bf16.msra.mxu1 %v5843_v26 }
0x180d   : >> { %5172 = vmatprep.subr.bf16.mxu1 %v5598_v5 }
0x1810   : >> { %5174 = vmatpush3.bf16.msra.mxu1 %v5851_v32 }
0x1811   : >> { %5175 = vmatprep.subr.bf16.mxu1 %v5598_v5 }
0x1814   : >> { %5177 = vmatpush3.bf16.msra.mxu1 %v5859_v38 }
0x1815   : >> { %5178 = vmatprep.subr.bf16.mxu1 %v5598_v5 }
0x1818   : >> { %5180 = vmatpush3.bf16.msra.mxu1 %v5893_v45 }
0x1819   : >> { %5181 = vmatprep.subr.bf16.mxu1 %v5598_v5 }
0x181c   : >> { %5183 = vmatpush3.bf16.msra.mxu1 %v5897_v48 }
0x181d   : >> { %5184 = vmatprep.subr.bf16.mxu1 %v5598_v5 }
0x1820   : >> { %5186 = vmatpush3.bf16.msra.mxu1 %v5900_v51 }
0x1821   : >> { %5211 = vmatprep.subr.bf16.mxu1 %v5598_v5 }
0x18d6   : >> { %v2361_v7 = vpop.f32.mrb[26].mxu1 }
0x18d7   : >> { %v2362_v10 = vadd.f32 %v6413_v43, %v2361_v7  ;;  %v4326_v11 = vpop.f32.mrb[27].mxu1 }
0x18d9   : >> { %v2365_v12 = vmul.f32 %v2362_v10, %v5939_v59 }
0x18db   : >> { %v2366_v13 = vadd.f32 %v2365_v12, %v6418_v53 }
0x18dd   : >> { %4360 = vmatmul.mubr.f32.vlgmr.msra.gmra.mrb[28].mxu0 %v2366_v13 }
0x18de   : >> { %5189 = vmatpush3.bf16.msra.mxu0 %v5817_v6  ;;  %4429 = vmatprep.mubr.msk.f32.mxu0 %vm5599_vm0, %v5600_v8 }
0x18df   : >> { %5190 = vmatprep.subr.bf16.mxu0 %v5598_v5 }
0x18e2   : >> { %5192 = vmatpush3.bf16.msra.mxu0 %v5825_v9 }
0x18e3   : >> { %5193 = vmatprep.subr.bf16.mxu0 %v5598_v5 }
0x18e6   : >> { %5195 = vmatpush3.bf16.msra.mxu0 %v5831_v17 }
0x18e7   : >> { %5196 = vmatprep.subr.bf16.mxu0 %v5598_v5 }
0x18ea   : >> { %5198 = vmatpush3.bf16.msra.mxu0 %v5839_v23 }
0x18eb   : >> { %5199 = vmatprep.subr.bf16.mxu0 %v5598_v5 }
0x18ee   : >> { %5201 = vmatpush3.bf16.msra.mxu0 %v5847_v29 }
0x18ef   : >> { %5202 = vmatprep.subr.bf16.mxu0 %v5598_v5 }
0x18f2   : >> { %5204 = vmatpush3.bf16.msra.mxu0 %v5855_v35 }
0x18f3   : >> { %5205 = vmatprep.subr.bf16.mxu0 %v5598_v5 }
0x18f6   : >> { %5207 = vmatpush3.bf16.msra.mxu0 %v5863_v39 }
0x18f7   : >> { %5208 = vmatprep.subr.bf16.mxu0 %v5598_v5 }
0x18fa   : >> { %5210 = vmatpush3.bf16.msra.mxu0 %v5869_v42 }
0x19b0   : >> { %v2433_v6 = vpop.f32.mrb[28].mxu0 }
0x19b1   : >> { %v2434_v9 = vadd.f32 %v6389_v34, %v2433_v6  ;;  %v4361_v17 = vpop.f32.mrb[29].mxu0 }
0x19b3   : >> { %5381 = vtanh.f32 %v2434_v9 }
0x19bd   : >> { %v5382_v23 = vpop.eup %5381 }
0x19be   : >> { %4395 = vmatmul.mubr.f32.vlgmr.msra.gmra.mrb[28].mxu1 %v5382_v23 }
0x19bf   : >> { %5213 = vmatpush3.bf16.msra.mxu1 %v5828_v14  ;;  %4464 = vmatprep.mubr.msk.f32.mxu1 %vm5599_vm0, %v5600_v8  ;;  %v2651_v8 = vmul.f32 2.0, %v2362_v10 }
0x19c0   : >> { %5214 = vmatprep.subr.bf16.mxu1 %v5598_v5 }
0x19c1   : >> { %v2652_v29 = vadd.f32 %v2651_v8, %v6459_v60 }
0x19c3   : >> { %5216 = vmatpush3.bf16.msra.mxu1 %v5835_v20 }
0x19c4   : >> { %5217 = vmatprep.subr.bf16.mxu1 %v5598_v5 }
0x19c7   : >> { %5219 = vmatpush3.bf16.msra.mxu1 %v5843_v26 }
0x19c8   : >> { %5220 = vmatprep.subr.bf16.mxu1 %v5598_v5 }
0x19cb   : >> { %5222 = vmatpush3.bf16.msra.mxu1 %v5851_v32 }
0x19cc   : >> { %5223 = vmatprep.subr.bf16.mxu1 %v5598_v5 }
0x19cf   : >> { %5225 = vmatpush3.bf16.msra.mxu1 %v5859_v38 }
0x19d0   : >> { %5226 = vmatprep.subr.bf16.mxu1 %v5598_v5 }
0x19d3   : >> { %5228 = vmatpush3.bf16.msra.mxu1 %v5893_v45 }
0x19d4   : >> { %5229 = vmatprep.subr.bf16.mxu1 %v5598_v5 }
0x19d7   : >> { %5231 = vmatpush3.bf16.msra.mxu1 %v5897_v48 }
0x19d8   : >> { %5232 = vmatprep.subr.bf16.mxu1 %v5598_v5 }
0x19db   : >> { %5234 = vmatpush3.bf16.msra.mxu1 %v5900_v51 }
0x1a91   : >> { %v2504_v14 = vpop.f32.mrb[28].mxu1 }
0x1a92   : >> { %v2505_v20 = vadd.f32 %v6413_v43, %v2504_v14  ;;  %v4396_v26 = vpop.f32.mrb[29].mxu1 }
0x1a94   : >> { %v2508_v32 = vmul.f32 %v2505_v20, %v6025_v24  ;;  %v2653_v35 = vmul.f32 2.0, %v2505_v20 }
0x1a96   : >> { %v2509_v38 = vadd.f32 %v2508_v32, %v6418_v53  ;;  %v2654_v39 = vadd.f32 %v2653_v35, %v2652_v29 }
0x1a98   : >> { %4430 = vmatmul.mubr.f32.vlgmr.msra.gmra.mrb[30].mxu0 %v2509_v38 }
0x1b6b   : >> { %v2576_v42 = vpop.f32.mrb[30].mxu0 }
0x1b6c   : >> { %v2577_v5 = vadd.f32 %v6389_v34, %v2576_v42  ;;  %v4431_v45 = vpop.f32.mrb[31].mxu0 }
0x1b6e   : >> { %5383 = vtanh.f32 %v2577_v5 }
0x1b78   : >> { %v5384_v48 = vpop.eup %5383 }
0x1b79   : >> { %4465 = vmatmul.mubr.f32.vlgmr.msra.gmra.mrb[30].mxu1 %v5384_v48 }
0x1c4c   : >> { %v2647_v51 = vpop.f32.mrb[30].mxu1 }
0x1c4d   : >> { %v2648_v59 = vadd.f32 %v6413_v43, %v2647_v51  ;;  %v4466_v15 = vpop.f32.mrb[31].mxu1 }
0x1c4f   : >> { %v2655_v16 = vadd.f32 %v2654_v39, %v2648_v59  ;;  %286 = sbr.rel (!%p283_p13) target bundleno = 123 (0x7b), region = 98 }
0x1c51   : >> { %v2656_v24 = vmul.f32 %v2655_v16, %v6070_v47 }
0x1c53   : >> { %v2657_v18 = vadd.f32 %v2656_v24, %v6418_v53  }
0x1c55   : >> { %2660 = vst [vmem:[%s2659_s0] sm:$0xff] %v2657_v18  ;;  %v6636_v1 = vmov %v2657_v18  ;;  %2661 = vst [vmem:[#allocation2] sm:$0xff] (%p283_p13), %v2657_v18 }
0x1c56   : > { %5494 = shalt.err (!%p5491_p12)
}
0x1c57   : > { %s5495_s24 = scalar_lea.hbm %s6558_s28, 512  ;;  %s5499_s21 = scalar_lea.hbm %s6617_s6, 1024 }
0x1c58   : > { %p5496_p1 = scmp.ne.s32.totalorder %s6558_s28, %s5495_s24  ;;  %p5500_p2 = scmp.lt.u32.totalorder %s6558_s28, %s6617_s6 }
0x1c59   : > { %p5501_p11 = scmp.lt.u32.totalorder %s5499_s21, %s5495_s24  ;;  %p5503_p0 = scmp.lt.u32.totalorder %s5495_s24, %s6558_s28 }
0x1c5a   : > { %p5497_p7 = pnand %p5496_p1, %p6637_p3 }
0x1c5b   : > { %p5502_p13 = por %p5501_p11, %p5500_p2 }
0x1c5c   : > { %p5498_p4 = pneg %p5497_p7 }
0x1c5d   : > { %p5504_p5 = por %p5503_p0, %p5502_p13 }
0x1c5f   : > { %p5505_p6 = pnand %p5504_p5, %p5498_p4 }
0x1c61   : > { %5508 = shalt.err (!%p5505_p6)
}
0x1c62   : > { %s5602_s30 = smov 128   ;;  %s5603_s0 = smov 8  }
0x1c63   : > { %5247 = dma.vmem_to_hbm [thread:$0]  (%p6637_p3), %s6561_s26, 512, %s6558_s28, %s6565_s27, %s5602_s30, %s5602_s30, %s5603_s0  }
0x1c64 PF: > { %p5269_p8 = scmp.ge.s32.totalorder %s5582_s12, 2  ;;  %s2692_s15 = sand.u32 1, %s5562_s7  }
0x1c65   : > { %p6638_p9 = scmp.ne.s32.totalorder %s6628_s18, 0  ;;  %s2693_s17 = scalar_lea.sflag [#allocation7], %s2692_s15 }
0x1c67   : > { %p5260_p10 = pnand %p5269_p8, %p6638_p9 }
0x1c69   : > { %5557 = dma.done.wait (!%p5260_p10), %s2693_s17, 512  }
0x1c6a   : > { %5559 = vsyncadd (!%p5260_p10), %s2693_s17, 4294966784  ;;  %s25_s12 = sadd.s32 1, %s5582_s12   ;;  %s6639_s10 = sld [smem:[#allocation16_spill]] }
0x1c6b   : > { %p22_p12 = scmp.ge.s32.totalorder %s25_s12, 4   ;;  %s6640_s11 = sld [smem:[#allocation17_spill]] }
0x1c6c   : > { %s6641_s7 = smov %s5566_s8  ;;  %s6642_s8 = smov %s5570_s9 }
0x1c6d   : > { %s6643_s9 = smov %s5704_s19  ;;  %24 = sbr.rel (!%p22_p12) target bundleno = 18 (0x12), region = 109 }
0x1c74   :  { %2698 = vsyncpa [#allocation6], 1 }
0x1c75   :  { %2700 = vsyncpa [#allocation6 + $0x1], 1 }
0x1c76   :  { %2701 = vsyncpa [#allocation9], 1 }
0x1c77   :  { %2702 = vsyncpa [#allocation7], 1 }
0x1c78   :  { %2704 = vsyncpa [#allocation7 + $0x1], 1 }

</bundles_post_ra>
